<compile_context>
chip_gen: v7x
topology: tpu7x:2x2x1
jax: 0.10.0
libtpu: 0.0.40
codegen_flags: <defaults>
</compile_context>

<pallas_src>
import functools

import numpy as np
import jax
import jax.numpy as jnp
from jax import lax
from jax.experimental import pallas as pl
from jax.experimental.pallas import tpu as pltpu


_CONV2_OUT = 7                               # conv2 output is 7x7
_ROWS_REAL = _CONV2_OUT * _CONV2_OUT         # 49 real rows per image
_ROWS_PER_IMG = 56                           # padded to a multiple of 8 (zero rows 49..55)
_Q_COLS = 16 * 16                            # 16 conv2 taps x 16 conv1-tap pixels = 256


# ---------------------------------------------------------------------------
# Fused Pallas kernel: conv1 + LeakyReLU + conv2 + BatchNorm + LeakyReLU + conv3
# ---------------------------------------------------------------------------

def _fused_disc_kernel(q_ref, w1_ref, w2_ref, bias_ref, g_ref, beta_ref,
                       w3_ref, b3_ref, o_ref, *, n_img):
    # conv1 evaluated for every (conv2 position, tap): this IS conv2's im2col patch
    # matrix, built directly in VMEM.  K=256 -> one full MXU pass on v6e/v7x.
    p2 = jnp.dot(q_ref[...], w1_ref[...], preferred_element_type=jnp.float32)  # (R,1024)

    # conv1 bias, masked per (conv2 row, tap) validity so conv2-padding taps and the
    # zero padding rows 49..55 stay exactly 0 (keeps BN sums correct).
    bias_full = jnp.concatenate([bias_ref[...]] * n_img, axis=0)               # (R,1024)
    p2 = p2 + bias_full
    p2 = jnp.maximum(p2, 0.2 * p2)                                             # LeakyReLU

    # conv2 (bias omitted: cancelled by train-mode BN mean subtraction).
    y2 = jnp.dot(p2.astype(jnp.bfloat16), w2_ref[...],
                 preferred_element_type=jnp.float32)                           # (R,128)

    # BatchNorm2d, training-mode batch statistics, single pass (sum & sum-of-squares).
    # Padding rows are exactly zero, so they drop out of the sums; divide by real count.
    inv_n = 1.0 / float(n_img * _ROWS_REAL)
    s1 = jnp.sum(y2, axis=0, keepdims=True)
    s2 = jnp.sum(y2 * y2, axis=0, keepdims=True)
    mean = s1 * inv_n
    var = jnp.maximum(s2 * inv_n - mean * mean, 0.0)
    scale = g_ref[...] * lax.rsqrt(var + 1e-5)
    shift = beta_ref[...] - mean * scale
    h2 = y2 * scale + shift
    h2 = jnp.maximum(h2, 0.2 * h2)                                             # (R,128)

    # conv3 (128->1, 7x7) as VPU multiply + reductions (no MXU, no width-1 store).
    # w3_ref (56,128) has zero rows 49..55, masking the padding rows' garbage BN output.
    w3 = w3_ref[...]
    rows = []
    for n in range(n_img):                                                     # tiny static unroll
        zn = h2[n * _ROWS_PER_IMG:(n + 1) * _ROWS_PER_IMG, :] * w3             # 8-aligned slice
        s = jnp.sum(zn, axis=0, keepdims=True)                                 # (1, 128)
        s = jnp.sum(s, axis=1, keepdims=True) + b3_ref[...]                    # (1, 1)
        rows.append(jnp.broadcast_to(s, (1, 128)))                             # lane-dense row
    o_ref[...] = jnp.concatenate(rows, axis=0)                                 # (n_img, 128)


def _full_spec(shape):
    nd = len(shape)
    return pl.BlockSpec(shape, lambda i, _nd=nd: (0,) * _nd)


def _fused_forward_call(q, w1big, w2, bias_blk, gamma, beta, w3_blk, b3, n_img):
    args = (q, w1big, w2, bias_blk, gamma, beta, w3_blk, b3)
    kernel = functools.partial(_fused_disc_kernel, n_img=n_img)
    return pl.pallas_call(
        kernel,
        out_shape=jax.ShapeDtypeStruct((n_img, 128), jnp.float32),
        grid=(1,),
        in_specs=[_full_spec(a.shape) for a in args],
        out_specs=_full_spec((n_img, 128)),
        compiler_params=pltpu.CompilerParams(
            dimension_semantics=("arbitrary",),
            vmem_limit_bytes=8 * 1024 * 1024,
        ),
    )(*args)


# ---------------------------------------------------------------------------
# Wrapper-side constants / parameter preprocessing (done once)
# ---------------------------------------------------------------------------

def _build_q_constants():
    """Gather indices for the two-level im2col of the (zero-padded 30x30) input, plus a
    (row, tap) validity mask used to build the masked conv1-bias matrix."""
    row_idx = np.zeros((_ROWS_PER_IMG, _Q_COLS), dtype=np.int32)     # idx 0 -> zero pixel
    bias_mask = np.zeros((_ROWS_PER_IMG, 16), dtype=np.float32)
    for oh2 in range(_CONV2_OUT):
        for ow2 in range(_CONV2_OUT):
            r = oh2 * _CONV2_OUT + ow2
            for i in range(4):
                for j in range(4):
                    blk = i * 4 + j
                    oh1 = 2 * oh2 + i - 1          # conv1 output feeding this conv2 tap
                    ow1 = 2 * ow2 + j - 1
                    if 0 <= oh1 < 14 and 0 <= ow1 < 14:
                        bias_mask[r, blk] = 1.0
                        for di in range(4):
                            for dj in range(4):
                                c = blk * 16 + di * 4 + dj
                                row_idx[r, c] = (2 * oh1 + di) * 30 + (2 * ow1 + dj)
                    # invalid taps (conv2 padding): indices stay 0 -> xpad[0] == 0
    return row_idx, bias_mask


_ROW_IDX_NP, _BIAS_MASK_NP = _build_q_constants()


def prepare_params(params):
    """One-time parameter repacking (PyTorch OIHW -> matmul-friendly layouts, bf16 MXU feeds)."""
    # conv1: (64,1,4,4) -> (16,64); block-diagonal (256,1024) for the two-level im2col.
    w1_2d = jnp.transpose(params["w1"], (2, 3, 1, 0)).reshape(16, 64)
    w1big = jnp.kron(jnp.eye(16, dtype=jnp.float32), w1_2d).astype(jnp.bfloat16)   # (256,1024)
    # conv1 bias as a validity-masked (56, 1024) matrix (zero on invalid taps / pad rows).
    bias_blk = (jnp.asarray(_BIAS_MASK_NP)[:, :, None] *
                params["b1"][None, None, :]).reshape(_ROWS_PER_IMG, 1024).astype(jnp.float32)
    # conv2: (128,64,4,4) -> (1024,128), row order (kh, kw, cin) matches P2's column order.
    w2_2d = jnp.transpose(params["w2"], (2, 3, 1, 0)).reshape(1024, 128).astype(jnp.bfloat16)
    # conv3: (1,128,7,7) -> (49,128) with zero rows padding each image block to 56 rows.
    w3_2d = jnp.transpose(params["w3"][0], (1, 2, 0)).reshape(_ROWS_REAL, 128)
    w3_blk = jnp.concatenate(
        [w3_2d, jnp.zeros((_ROWS_PER_IMG - _ROWS_REAL, 128), jnp.float32)], axis=0)
    return {
        "w1big": w1big,
        "bias_blk": bias_blk,
        "w2": w2_2d,
        "gamma": params["gamma2"].reshape(1, 128).astype(jnp.float32),
        "beta": params["beta2"].reshape(1, 128).astype(jnp.float32),
        "w3_blk": w3_blk.astype(jnp.float32),
        "b3": params["b3"].reshape(1, 1).astype(jnp.float32),
    }
    # note: conv2's bias b2 is intentionally not used (cancelled by train-mode BatchNorm)


# ---------------------------------------------------------------------------
# Forward pass (one gather as per-call XLA glue + one Pallas kernel)
# ---------------------------------------------------------------------------

@jax.jit
def gan_discriminator_forward(x_nchw, prep):
    n, c, h, w = x_nchw.shape
    assert (c, h, w) == (1, 28, 28), "architecture requires 1x28x28 inputs"
    x = x_nchw[:, 0].astype(jnp.float32)                               # (N, 28, 28)
    xpad = jnp.pad(x, ((0, 0), (1, 1), (1, 1))).reshape(n, 30 * 30)    # conv1 padding
    xpad = xpad.astype(jnp.bfloat16)                                   # MXU feed dtype
    # Two-level im2col: a single gather (invalid taps point at the zero padding pixel).
    q = xpad[:, _ROW_IDX_NP].reshape(n * _ROWS_PER_IMG, _Q_COLS)       # (N*56, 256) bf16
    out = _fused_forward_call(q, prep["w1big"], prep["w2"], prep["bias_blk"],
                              prep["gamma"], prep["beta"], prep["w3_blk"], prep["b3"], n)
    return out[:, 0]                                                   # (N,)


# ---------------------------------------------------------------------------
# Pure-JAX reference (lax convs, NCHW) for verification
# ---------------------------------------------------------------------------

def _ref_forward(x, params, *, bf16_inputs=False):
    # bf16_inputs=True applies the same roundings the kernel's bf16 MXU feeds apply
    # (x, w1, post-LeakyReLU h1, w2); biases / BN stay f32, matching the kernel.
    def q(a):
        return a.astype(jnp.bfloat16).astype(jnp.float32) if bf16_inputs else a

    dn = ("NCHW", "OIHW", "NCHW")
    y = lax.conv_general_dilated(q(x), q(params["w1"]), (2, 2), ((1, 1), (1, 1)),
                                 dimension_numbers=dn) + params["b1"][None, :, None, None]
    y = jnp.where(y > 0, y, 0.2 * y)
    y = q(y)
    y = lax.conv_general_dilated(y, q(params["w2"]), (2, 2), ((1, 1), (1, 1)),
                                 dimension_numbers=dn) + params["b2"][None, :, None, None]
    mean = jnp.mean(y, axis=(0, 2, 3), keepdims=True)
    var = jnp.mean((y - mean) ** 2, axis=(0, 2, 3), keepdims=True)
    y = (y - mean) * lax.rsqrt(var + 1e-5)
    y = y * params["gamma2"][None, :, None, None] + params["beta2"][None, :, None, None]
    y = jnp.where(y > 0, y, 0.2 * y)
    y = lax.conv_general_dilated(y, params["w3"], (1, 1), ((0, 0), (0, 0)),
                                 dimension_numbers=dn) + params["b3"][None, :, None, None]
    return y.reshape(-1)


# ---------------------------------------------------------------------------
# Main
# ---------------------------------------------------------------------------

if __name__ == "__main__":
    key = jax.random.PRNGKey(0)
    ks = jax.random.split(key, 9)

    # Deterministic synthetic parameters (PyTorch OIHW layout).
    params = {
        "w1": 0.05 * jax.random.normal(ks[0], (64, 1, 4, 4), jnp.float32),
        "b1": 0.05 * jax.random.normal(ks[1], (64,), jnp.float32),
        "w2": 0.05 * jax.random.normal(ks[2], (128, 64, 4, 4), jnp.float32),
        "b2": 0.05 * jax.random.normal(ks[3], (128,), jnp.float32),
        "gamma2": 1.0 + 0.1 * jax.random.normal(ks[4], (128,), jnp.float32),
        "beta2": 0.1 * jax.random.normal(ks[5], (128,), jnp.float32),
        "w3": 0.05 * jax.random.normal(ks[6], (1, 128, 7, 7), jnp.float32),
        "b3": 0.05 * jax.random.normal(ks[7], (1,), jnp.float32),
    }

    # Input: batch=2, 1 channel, 28x28 (conv3's 7x7 kernel must exactly cover the final map).
    x = jax.random.normal(ks[8], (2, 1, 28, 28), jnp.float32)

    prep = prepare_params(params)
    out = jax.block_until_ready(gan_discriminator_forward(x, prep))
    assert out.shape == (2,), out.shape

    # Tight check vs a reference that applies the same bf16 roundings as the kernel's MXU feeds.
    ref_q = jax.block_until_ready(_ref_forward(x, params, bf16_inputs=True))
    assert jnp.allclose(out, ref_q, rtol=1e-2, atol=1e-2), (out, ref_q)

    # Looser check vs the exact f32 module semantics (difference is bf16 input rounding only).
    ref = jax.block_until_ready(_ref_forward(x, params, bf16_inputs=False))
    assert jnp.allclose(out, ref, rtol=5e-2, atol=2.5e-1), (out, ref)

    print("KERNEL_OK")
</pallas_src>

<mosaic_0001>
module attributes {stable_mosaic.version = 11 : i64} {
  func.func @_fused_disc_kernel(%arg0: i32, %arg1: memref<112x256xbf16, #tpu.memory_space<vmem>>, %arg2: memref<256x1024xbf16, #tpu.memory_space<vmem>>, %arg3: memref<1024x128xbf16, #tpu.memory_space<vmem>>, %arg4: memref<56x1024xf32, #tpu.memory_space<vmem>>, %arg5: memref<1x128xf32, #tpu.memory_space<vmem>>, %arg6: memref<1x128xf32, #tpu.memory_space<vmem>>, %arg7: memref<56x128xf32, #tpu.memory_space<vmem>>, %arg8: memref<1x1xf32, #tpu.memory_space<vmem>>, %arg9: memref<2x128xf32, #tpu.memory_space<vmem>>) attributes {dimension_semantics = [#tpu.dimension_semantics<arbitrary>], iteration_bounds = array<i64: 1>, scalar_prefetch = 0 : i64, scratch_operands = 0 : i64, tpu.core_type = #tpu.core_type<tc>, window_params = [{pipeline_mode = #tpu.pipeline_mode<synchronous>, transform_indices = @transform_0, window_bounds = array<i64: 112, 256>}, {pipeline_mode = #tpu.pipeline_mode<synchronous>, transform_indices = @transform_1, window_bounds = array<i64: 256, 1024>}, {pipeline_mode = #tpu.pipeline_mode<synchronous>, transform_indices = @transform_2, window_bounds = array<i64: 1024, 128>}, {pipeline_mode = #tpu.pipeline_mode<synchronous>, transform_indices = @transform_3, window_bounds = array<i64: 56, 1024>}, {pipeline_mode = #tpu.pipeline_mode<synchronous>, transform_indices = @transform_4, window_bounds = array<i64: 1, 128>}, {pipeline_mode = #tpu.pipeline_mode<synchronous>, transform_indices = @transform_5, window_bounds = array<i64: 1, 128>}, {pipeline_mode = #tpu.pipeline_mode<synchronous>, transform_indices = @transform_6, window_bounds = array<i64: 56, 128>}, {pipeline_mode = #tpu.pipeline_mode<synchronous>, transform_indices = @transform_7, window_bounds = array<i64: 1, 1>}, {pipeline_mode = #tpu.pipeline_mode<synchronous>, transform_indices = @transform_8, window_bounds = array<i64: 2, 128>}]} {
    %c0 = arith.constant 0 : index
    %c0_0 = arith.constant 0 : index
    %0 = vector.load %arg1[%c0, %c0_0] : memref<112x256xbf16, #tpu.memory_space<vmem>>, vector<112x256xbf16>
    %c0_1 = arith.constant 0 : index
    %c0_2 = arith.constant 0 : index
    %1 = vector.load %arg2[%c0_1, %c0_2] : memref<256x1024xbf16, #tpu.memory_space<vmem>>, vector<256x1024xbf16>
    %cst = arith.constant dense<0.000000e+00> : vector<112x1024xf32>
    %2 = tpu.matmul %0, %1, %cst {dimension_numbers = #tpu.dot_dimension_numbers<[1], [0], [0], [1], [0, 0, 1, 1], [], []>} : vector<112x256xbf16>, vector<256x1024xbf16>, vector<112x1024xf32> -> vector<112x1024xf32>
    %c0_3 = arith.constant 0 : index
    %c0_4 = arith.constant 0 : index
    %3 = vector.load %arg4[%c0_3, %c0_4] : memref<56x1024xf32, #tpu.memory_space<vmem>>, vector<56x1024xf32>
    %4 = tpu.concatenate %3, %3 in 0 : vector<56x1024xf32>, vector<56x1024xf32> -> vector<112x1024xf32>
    %5 = arith.addf %2, %4 : vector<112x1024xf32>
    %cst_5 = arith.constant 2.000000e-01 : f32
    %6 = vector.broadcast %cst_5 : f32 to vector<112x1024xf32>
    %7 = arith.mulf %6, %5 : vector<112x1024xf32>
    %8 = arith.maximumf %5, %7 : vector<112x1024xf32>
    %9 = arith.truncf %8 : vector<112x1024xf32> to vector<112x1024xbf16>
    %c0_6 = arith.constant 0 : index
    %c0_7 = arith.constant 0 : index
    %10 = vector.load %arg3[%c0_6, %c0_7] : memref<1024x128xbf16, #tpu.memory_space<vmem>>, vector<1024x128xbf16>
    %cst_8 = arith.constant dense<0.000000e+00> : vector<112x128xf32>
    %11 = tpu.matmul %9, %10, %cst_8 {dimension_numbers = #tpu.dot_dimension_numbers<[1], [0], [0], [1], [0, 0, 1, 1], [], []>} : vector<112x1024xbf16>, vector<1024x128xbf16>, vector<112x128xf32> -> vector<112x128xf32>
    %cst_9 = arith.constant dense<0.000000e+00> : vector<128xf32>
    %12 = vector.multi_reduction <add>, %11, %cst_9 [0] : vector<112x128xf32> to vector<128xf32>
    %13 = vector.shape_cast %12 : vector<128xf32> to vector<1x128xf32>
    %14 = arith.mulf %11, %11 : vector<112x128xf32>
    %cst_10 = arith.constant dense<0.000000e+00> : vector<128xf32>
    %15 = vector.multi_reduction <add>, %14, %cst_10 [0] : vector<112x128xf32> to vector<128xf32>
    %16 = vector.shape_cast %15 : vector<128xf32> to vector<1x128xf32>
    %cst_11 = arith.constant 0.0102040814 : f32
    %17 = vector.broadcast %cst_11 : f32 to vector<1x128xf32>
    %18 = arith.mulf %13, %17 : vector<1x128xf32>
    %cst_12 = arith.constant 0.0102040814 : f32
    %19 = vector.broadcast %cst_12 : f32 to vector<1x128xf32>
    %20 = arith.mulf %16, %19 : vector<1x128xf32>
    %21 = arith.mulf %18, %18 : vector<1x128xf32>
    %22 = arith.subf %20, %21 : vector<1x128xf32>
    %cst_13 = arith.constant 0.000000e+00 : f32
    %23 = vector.broadcast %cst_13 : f32 to vector<1x128xf32>
    %24 = arith.maximumf %22, %23 : vector<1x128xf32>
    %c0_14 = arith.constant 0 : index
    %c0_15 = arith.constant 0 : index
    %25 = vector.load %arg5[%c0_14, %c0_15] : memref<1x128xf32, #tpu.memory_space<vmem>>, vector<1x128xf32>
    %cst_16 = arith.constant 9.99999974E-6 : f32
    %26 = vector.broadcast %cst_16 : f32 to vector<1x128xf32>
    %27 = arith.addf %24, %26 : vector<1x128xf32>
    %28 = math.rsqrt %27 : vector<1x128xf32>
    %29 = arith.mulf %25, %28 : vector<1x128xf32>
    %c0_17 = arith.constant 0 : index
    %c0_18 = arith.constant 0 : index
    %30 = vector.load %arg6[%c0_17, %c0_18] : memref<1x128xf32, #tpu.memory_space<vmem>>, vector<1x128xf32>
    %31 = arith.mulf %18, %29 : vector<1x128xf32>
    %32 = arith.subf %30, %31 : vector<1x128xf32>
    %33 = vector.broadcast %29 : vector<1x128xf32> to vector<112x128xf32>
    %34 = arith.mulf %11, %33 : vector<112x128xf32>
    %35 = vector.broadcast %32 : vector<1x128xf32> to vector<112x128xf32>
    %36 = arith.addf %34, %35 : vector<112x128xf32>
    %cst_19 = arith.constant 2.000000e-01 : f32
    %37 = vector.broadcast %cst_19 : f32 to vector<112x128xf32>
    %38 = arith.mulf %37, %36 : vector<112x128xf32>
    %39 = arith.maximumf %36, %38 : vector<112x128xf32>
    %c0_20 = arith.constant 0 : index
    %c0_21 = arith.constant 0 : index
    %40 = vector.load %arg7[%c0_20, %c0_21] : memref<56x128xf32, #tpu.memory_space<vmem>>, vector<56x128xf32>
    %41 = vector.extract_strided_slice %39 {offsets = [0, 0], sizes = [56, 128], strides = [1, 1]} : vector<112x128xf32> to vector<56x128xf32>
    %42 = arith.mulf %41, %40 : vector<56x128xf32>
    %cst_22 = arith.constant dense<0.000000e+00> : vector<128xf32>
    %43 = vector.multi_reduction <add>, %42, %cst_22 [0] : vector<56x128xf32> to vector<128xf32>
    %44 = vector.shape_cast %43 : vector<128xf32> to vector<1x128xf32>
    %cst_23 = arith.constant dense<0.000000e+00> : vector<1xf32>
    %45 = vector.multi_reduction <add>, %44, %cst_23 [1] : vector<1x128xf32> to vector<1xf32>
    %46 = vector.shape_cast %45 : vector<1xf32> to vector<1x1xf32>
    %c0_24 = arith.constant 0 : index
    %c0_25 = arith.constant 0 : index
    %47 = vector.load %arg8[%c0_24, %c0_25] : memref<1x1xf32, #tpu.memory_space<vmem>>, vector<1x1xf32>
    %48 = arith.addf %46, %47 : vector<1x1xf32>
    %49 = vector.shape_cast %48 : vector<1x1xf32> to vector<1x1xf32>
    %50 = vector.broadcast %49 : vector<1x1xf32> to vector<1x128xf32>
    %51 = vector.extract_strided_slice %39 {offsets = [56, 0], sizes = [56, 128], strides = [1, 1]} : vector<112x128xf32> to vector<56x128xf32>
    %52 = arith.mulf %51, %40 : vector<56x128xf32>
    %cst_26 = arith.constant dense<0.000000e+00> : vector<128xf32>
    %53 = vector.multi_reduction <add>, %52, %cst_26 [0] : vector<56x128xf32> to vector<128xf32>
    %54 = vector.shape_cast %53 : vector<128xf32> to vector<1x128xf32>
    %cst_27 = arith.constant dense<0.000000e+00> : vector<1xf32>
    %55 = vector.multi_reduction <add>, %54, %cst_27 [1] : vector<1x128xf32> to vector<1xf32>
    %56 = vector.shape_cast %55 : vector<1xf32> to vector<1x1xf32>
    %c0_28 = arith.constant 0 : index
    %c0_29 = arith.constant 0 : index
    %57 = vector.load %arg8[%c0_28, %c0_29] : memref<1x1xf32, #tpu.memory_space<vmem>>, vector<1x1xf32>
    %58 = arith.addf %56, %57 : vector<1x1xf32>
    %59 = vector.shape_cast %58 : vector<1x1xf32> to vector<1x1xf32>
    %60 = vector.broadcast %59 : vector<1x1xf32> to vector<1x128xf32>
    %61 = tpu.concatenate %50, %60 in 0 : vector<1x128xf32>, vector<1x128xf32> -> vector<2x128xf32>
    %c0_30 = arith.constant 0 : index
    %c0_31 = arith.constant 0 : index
    %62 = vector.load %arg9[%c0_30, %c0_31] : memref<2x128xf32, #tpu.memory_space<vmem>>, vector<2x128xf32>
    tpu.vector_store %arg9[%c0_30, %c0_31], %61 {strides = array<i32>} : memref<2x128xf32, #tpu.memory_space<vmem>>, vector<2x128xf32>,
    return
  }
  func.func @transform_0(%arg0: i32) -> (i32, i32) {
    %c0_i32 = arith.constant 0 : i32
    %c0_i32_0 = arith.constant 0 : i32
    %c0_i32_1 = arith.constant 0 : i32
    return %c0_i32, %c0_i32_0 : i32, i32
  }
  func.func @transform_1(%arg0: i32) -> (i32, i32) {
    %c0_i32 = arith.constant 0 : i32
    %c0_i32_0 = arith.constant 0 : i32
    %c0_i32_1 = arith.constant 0 : i32
    return %c0_i32, %c0_i32_0 : i32, i32
  }
  func.func @transform_2(%arg0: i32) -> (i32, i32) {
    %c0_i32 = arith.constant 0 : i32
    %c0_i32_0 = arith.constant 0 : i32
    %c0_i32_1 = arith.constant 0 : i32
    return %c0_i32, %c0_i32_0 : i32, i32
  }
  func.func @transform_3(%arg0: i32) -> (i32, i32) {
    %c0_i32 = arith.constant 0 : i32
    %c0_i32_0 = arith.constant 0 : i32
    %c0_i32_1 = arith.constant 0 : i32
    return %c0_i32, %c0_i32_0 : i32, i32
  }
  func.func @transform_4(%arg0: i32) -> (i32, i32) {
    %c0_i32 = arith.constant 0 : i32
    %c0_i32_0 = arith.constant 0 : i32
    %c0_i32_1 = arith.constant 0 : i32
    return %c0_i32, %c0_i32_0 : i32, i32
  }
  func.func @transform_5(%arg0: i32) -> (i32, i32) {
    %c0_i32 = arith.constant 0 : i32
    %c0_i32_0 = arith.constant 0 : i32
    %c0_i32_1 = arith.constant 0 : i32
    return %c0_i32, %c0_i32_0 : i32, i32
  }
  func.func @transform_6(%arg0: i32) -> (i32, i32) {
    %c0_i32 = arith.constant 0 : i32
    %c0_i32_0 = arith.constant 0 : i32
    %c0_i32_1 = arith.constant 0 : i32
    return %c0_i32, %c0_i32_0 : i32, i32
  }
  func.func @transform_7(%arg0: i32) -> (i32, i32) {
    %c0_i32 = arith.constant 0 : i32
    %c0_i32_0 = arith.constant 0 : i32
    %c0_i32_1 = arith.constant 0 : i32
    return %c0_i32, %c0_i32_0 : i32, i32
  }
  func.func @transform_8(%arg0: i32) -> (i32, i32) {
    %c0_i32 = arith.constant 0 : i32
    %c0_i32_0 = arith.constant 0 : i32
    %c0_i32_1 = arith.constant 0 : i32
    return %c0_i32, %c0_i32_0 : i32, i32
  }
}

</mosaic_0001>

<bundles_post_ra>
// kernel: gan_discriminator_forward.1
= control target key start
LH: loop header
LB: loop body
LE: loop exit
PB: predicated region body
PF: predicated region fallthrough
CT: control target
= control target key end

     0   :  { %vm2702_vm0 = vcmask 1040384   ;;  %s4566_s1 = inlined_call_operand.vmem [shape: bf16[256,1024], index: 1, kind: input, shape index: {}]   ;;  %s4567_s0 = inlined_call_operand.vmem [shape: bf16[112,256], index: 0, kind: input, shape index: {}]   ;;  %s4568_s2 = inlined_call_operand.vmem [shape: bf16[1024,128], index: 2, kind: input, shape index: {}]   ;;  %s4569_s3 = inlined_call_operand.vmem [shape: f32[56,1024], index: 3, kind: input, shape index: {}]   ;;  %s4570_s7 = inlined_call_operand.<no memory space> [shape: f32[1,1], index: 7, kind: input, shape index: {}]   ;;  %s4571_s4 = inlined_call_operand.vmem [shape: f32[1,128], index: 4, kind: input, shape index: {}]   ;;  %s4572_s5 = inlined_call_operand.vmem [shape: f32[1,128], index: 5, kind: input, shape index: {}]   ;;  %s4573_s6 = inlined_call_operand.vmem [shape: f32[56,128], index: 6, kind: input, shape index: {}]   ;;  %s4574_s8 = inlined_call_operand.vmem [shape: f32[2,128], index: 8, kind: output, shape index: {}]  }
   0x1   :  { %v46_v0 = vld [vmem:[%s4566_s1] sm:$0xff]  ;;  %v47_v2 = vld [vmem:[%s4566_s1 + $0x8] sm:$0xff] }
   0x2   :  { %v50_v1 = vld [vmem:[%s4566_s1 + $0x20] sm:$0xff]  ;;  %v51_v4 = vld [vmem:[%s4566_s1 + $0x28] sm:$0xff] }
   0x3   :  { %v2724_v3 = vcombine.high %v46_v0, %v50_v1  ;;  %v2723_v5 = vcombine.low %v46_v0, %v50_v1  ;;  %v54_v6 = vld [vmem:[%s4566_s1 + $0x40] sm:$0xff]  ;;  %v2726_v8 = vcombine.high %v47_v2, %v51_v4  ;;  %v2725_v9 = vcombine.low %v47_v2, %v51_v4  ;;  %v55_v11 = vld [vmem:[%s4566_s1 + $0x48] sm:$0xff] }
   0x4   :  { %v58_v7 = vld [vmem:[%s4566_s1 + $0x60] sm:$0xff]  ;;  %v59_v12 = vld [vmem:[%s4566_s1 + $0x68] sm:$0xff] }
   0x5   :  { %v2732_v10 = vcombine.high %v54_v6, %v58_v7  ;;  %v62_v13 = vld [vmem:[%s4566_s1 + $0x80] sm:$0xff]  ;;  %940 = vmatprep.subr.bf16.mxu0 %v2724_v3  ;;  %v2734_v14 = vcombine.high %v55_v11, %v59_v12  ;;  %v63_v16 = vld [vmem:[%s4566_s1 + $0x88] sm:$0xff]  ;;  %1043 = vmatprep.subr.bf16.mxu1 %v2726_v8  ;;  %v2731_v18 = vcombine.low %v54_v6, %v58_v7 }
   0x6   :  { %v66_v15 = vld [vmem:[%s4566_s1 + $0xa0] sm:$0xff]  ;;  %v67_v17 = vld [vmem:[%s4566_s1 + $0xa8] sm:$0xff]  ;;  %941 = vmatpush1.bf16.msra.mxu0 %v2723_v5  ;;  %1044 = vmatpush1.bf16.msra.mxu1 %v2725_v9  ;;  %v2733_v19 = vcombine.low %v55_v11, %v59_v12 }
   0x7   :  { %942 = vmatprep.subr.bf16.mxu0 %v2732_v10  ;;  %v2740_v20 = vcombine.high %v62_v13, %v66_v15  ;;  %1045 = vmatprep.subr.bf16.mxu1 %v2734_v14  ;;  %v2742_v21 = vcombine.high %v63_v16, %v67_v17  ;;  %v70_v22 = vld [vmem:[%s4566_s1 + $0xc0] sm:$0xff]  ;;  %v71_v24 = vld [vmem:[%s4566_s1 + $0xc8] sm:$0xff]  ;;  %v2739_v26 = vcombine.low %v62_v13, %v66_v15 }
   0x8   :  { %v74_v23 = vld [vmem:[%s4566_s1 + $0xe0] sm:$0xff]  ;;  %v75_v25 = vld [vmem:[%s4566_s1 + $0xe8] sm:$0xff]  ;;  %v2741_v27 = vcombine.low %v63_v16, %v67_v17 }
   0x9   :  { %v2748_v28 = vcombine.high %v70_v22, %v74_v23  ;;  %v2750_v29 = vcombine.high %v71_v24, %v75_v25  ;;  %v78_v30 = vld [vmem:[%s4566_s1 + $0x100] sm:$0xff]  ;;  %v79_v32 = vld [vmem:[%s4566_s1 + $0x108] sm:$0xff]  ;;  %v2747_v34 = vcombine.low %v70_v22, %v74_v23  ;;  %v2749_v35 = vcombine.low %v71_v24, %v75_v25 }
   0xa   :  { %943 = vmatpush1.bf16.msra.mxu0 %v2731_v18  ;;  %1046 = vmatpush1.bf16.msra.mxu1 %v2733_v19  ;;  %v82_v31 = vld [vmem:[%s4566_s1 + $0x120] sm:$0xff]  ;;  %v83_v33 = vld [vmem:[%s4566_s1 + $0x128] sm:$0xff] }
   0xb   :  { %944 = vmatprep.subr.bf16.mxu0 %v2740_v20  ;;  %1047 = vmatprep.subr.bf16.mxu1 %v2742_v21  ;;  %v2756_v36 = vcombine.high %v78_v30, %v82_v31  ;;  %v2758_v37 = vcombine.high %v79_v32, %v83_v33  ;;  %v86_v38 = vld [vmem:[%s4566_s1 + $0x140] sm:$0xff]  ;;  %v87_v40 = vld [vmem:[%s4566_s1 + $0x148] sm:$0xff]  ;;  %v2755_v42 = vcombine.low %v78_v30, %v82_v31 }
   0xc   :  { %v90_v39 = vld [vmem:[%s4566_s1 + $0x160] sm:$0xff]  ;;  %v91_v41 = vld [vmem:[%s4566_s1 + $0x168] sm:$0xff]  ;;  %v2757_v43 = vcombine.low %v79_v32, %v83_v33 }
   0xd   :  { %v2764_v44 = vcombine.high %v86_v38, %v90_v39  ;;  %v2766_v45 = vcombine.high %v87_v40, %v91_v41  ;;  %v94_v46 = vld [vmem:[%s4566_s1 + $0x180] sm:$0xff]  ;;  %v95_v48 = vld [vmem:[%s4566_s1 + $0x188] sm:$0xff]  ;;  %v2763_v50 = vcombine.low %v86_v38, %v90_v39  ;;  %v2765_v51 = vcombine.low %v87_v40, %v91_v41 }
   0xe   :  { %945 = vmatpush1.bf16.msra.mxu0 %v2739_v26  ;;  %1048 = vmatpush1.bf16.msra.mxu1 %v2741_v27  ;;  %v98_v47 = vld [vmem:[%s4566_s1 + $0x1a0] sm:$0xff]  ;;  %v99_v49 = vld [vmem:[%s4566_s1 + $0x1a8] sm:$0xff] }
   0xf   :  { %946 = vmatprep.subr.bf16.mxu0 %v2748_v28  ;;  %1049 = vmatprep.subr.bf16.mxu1 %v2750_v29  ;;  %v2772_v52 = vcombine.high %v94_v46, %v98_v47  ;;  %v2774_v53 = vcombine.high %v95_v48, %v99_v49  ;;  %v102_v54 = vld [vmem:[%s4566_s1 + $0x1c0] sm:$0xff]  ;;  %v103_v57 = vld [vmem:[%s4566_s1 + $0x1c8] sm:$0xff]  ;;  %v2771_v59 = vcombine.low %v94_v46, %v98_v47 }
  0x10   :  { %v106_v55 = vld [vmem:[%s4566_s1 + $0x1e0] sm:$0xff]  ;;  %v107_v58 = vld [vmem:[%s4566_s1 + $0x1e8] sm:$0xff]  ;;  %v2773_v60 = vcombine.low %v95_v48, %v99_v49 }
  0x11   :  { %v3376_v56 = vld [vmem:[%s4567_s0 + $0x4] ss:$8 sps:$4 sm:$0xff]   ;;  %v2780_v61 = vcombine.high %v102_v54, %v106_v55  ;;  %v2782_v62 = vcombine.high %v103_v57, %v107_v58  ;;  %v2779_v3 = vcombine.low %v102_v54, %v106_v55  ;;  %v2781_v4 = vcombine.low %v103_v57, %v107_v58 }
  0x12   :  { %947 = vmatpush1.bf16.msra.mxu0 %v2747_v34  ;;  %1050 = vmatpush1.bf16.msra.mxu1 %v2749_v35  ;;  %v110_v63 = vld [vmem:[%s4566_s1 + $0x200] sm:$0xff]  ;;  %v111_v1 = vld [vmem:[%s4566_s1 + $0x208] sm:$0xff] }
  0x13   :  { %948 = vmatprep.subr.bf16.mxu0 %v2756_v36  ;;  %1051 = vmatprep.subr.bf16.mxu1 %v2758_v37  ;;  %v114_v0 = vld [vmem:[%s4566_s1 + $0x220] sm:$0xff]  ;;  %v115_v2 = vld [vmem:[%s4566_s1 + $0x228] sm:$0xff] }
  0x14   :  { %972 = vmatprep.mubr.bf16.mxu0 %v3376_v56  ;;  %1075 = vmatprep.mubr.bf16.mxu1 %v3376_v56  ;;  %v2788_v5 = vcombine.high %v110_v63, %v114_v0  ;;  %v2790_v6 = vcombine.high %v111_v1, %v115_v2  ;;  %v118_v7 = vld [vmem:[%s4566_s1 + $0x240] sm:$0xff]  ;;  %v119_v9 = vld [vmem:[%s4566_s1 + $0x248] sm:$0xff]  ;;  %v2787_v11 = vcombine.low %v110_v63, %v114_v0  ;;  %v52_v0 = vld [vmem:[%s4566_s1 + $0x30] sm:$0xff] }
  0x15   :  { %v122_v8 = vld [vmem:[%s4566_s1 + $0x260] sm:$0xff]  ;;  %v123_v10 = vld [vmem:[%s4566_s1 + $0x268] sm:$0xff]  ;;  %v2789_v12 = vcombine.low %v111_v1, %v115_v2  ;;  %v49_v2 = vld [vmem:[%s4566_s1 + $0x18] sm:$0xff] }
  0x16   :  { %949 = vmatpush1.bf16.msra.mxu0 %v2755_v42  ;;  %1052 = vmatpush1.bf16.msra.mxu1 %v2757_v43  ;;  %v2796_v13 = vcombine.high %v118_v7, %v122_v8  ;;  %v2798_v14 = vcombine.high %v119_v9, %v123_v10  ;;  %v126_v15 = vld [vmem:[%s4566_s1 + $0x280] sm:$0xff]  ;;  %v127_v17 = vld [vmem:[%s4566_s1 + $0x288] sm:$0xff]  ;;  %v2795_v19 = vcombine.low %v118_v7, %v122_v8 }
  0x17   :  { %950 = vmatprep.subr.bf16.mxu0 %v2764_v44  ;;  %1053 = vmatprep.subr.bf16.mxu1 %v2766_v45  ;;  %v130_v16 = vld [vmem:[%s4566_s1 + $0x2a0] sm:$0xff]  ;;  %v131_v18 = vld [vmem:[%s4566_s1 + $0x2a8] sm:$0xff]  ;;  %v2797_v20 = vcombine.low %v119_v9, %v123_v10  ;;  %v60_v9 = vld [vmem:[%s4566_s1 + $0x70] sm:$0xff] }
  0x18   :  { %v2804_v21 = vcombine.high %v126_v15, %v130_v16  ;;  %v2806_v22 = vcombine.high %v127_v17, %v131_v18  ;;  %v134_v23 = vld [vmem:[%s4566_s1 + $0x2c0] sm:$0xff]  ;;  %v135_v25 = vld [vmem:[%s4566_s1 + $0x2c8] sm:$0xff]  ;;  %v2803_v27 = vcombine.low %v126_v15, %v130_v16  ;;  %v2805_v28 = vcombine.low %v127_v17, %v131_v18  ;;  %v64_v15 = vld [vmem:[%s4566_s1 + $0x90] sm:$0xff] }
  0x19   :  { %v138_v24 = vld [vmem:[%s4566_s1 + $0x2e0] sm:$0xff]  ;;  %v139_v26 = vld [vmem:[%s4566_s1 + $0x2e8] sm:$0xff]  ;;  %v68_v18 = vld [vmem:[%s4566_s1 + $0xb0] sm:$0xff] }
  0x1a   :  { %951 = vmatpush1.bf16.msra.mxu0 %v2763_v50  ;;  %1054 = vmatpush1.bf16.msra.mxu1 %v2765_v51  ;;  %v2812_v29 = vcombine.high %v134_v23, %v138_v24  ;;  %v2814_v30 = vcombine.high %v135_v25, %v139_v26  ;;  %v142_v31 = vld [vmem:[%s4566_s1 + $0x300] sm:$0xff]  ;;  %v143_v33 = vld [vmem:[%s4566_s1 + $0x308] sm:$0xff]  ;;  %v2811_v35 = vcombine.low %v134_v23, %v138_v24  ;;  %v72_v23 = vld [vmem:[%s4566_s1 + $0xd0] sm:$0xff] }
  0x1b   :  { %952 = vmatprep.subr.bf16.mxu0 %v2772_v52  ;;  %1055 = vmatprep.subr.bf16.mxu1 %v2774_v53  ;;  %v146_v32 = vld [vmem:[%s4566_s1 + $0x320] sm:$0xff]  ;;  %v147_v34 = vld [vmem:[%s4566_s1 + $0x328] sm:$0xff]  ;;  %v2813_v36 = vcombine.low %v135_v25, %v139_v26  ;;  %v3536_v25 = vld [vmem:[%s4567_s0 + $0x10] ss:$8 sps:$4 sm:$0xff]   ;;  %v2744_v26 = vcombine.high %v64_v15, %v68_v18 }
  0x1c   :  { %v2820_v37 = vcombine.high %v142_v31, %v146_v32  ;;  %v2822_v38 = vcombine.high %v143_v33, %v147_v34  ;;  %v150_v39 = vld [vmem:[%s4566_s1 + $0x340] sm:$0xff]  ;;  %v151_v41 = vld [vmem:[%s4566_s1 + $0x348] sm:$0xff]  ;;  %v2819_v43 = vcombine.low %v142_v31, %v146_v32  ;;  %v2821_v44 = vcombine.low %v143_v33, %v147_v34  ;;  %v80_v33 = vld [vmem:[%s4566_s1 + $0x110] sm:$0xff] }
  0x1d   :  { %v154_v40 = vld [vmem:[%s4566_s1 + $0x360] sm:$0xff]  ;;  %v155_v42 = vld [vmem:[%s4566_s1 + $0x368] sm:$0xff]  ;;  %v2743_v31 = vcombine.low %v64_v15, %v68_v18  ;;  %v84_v34 = vld [vmem:[%s4566_s1 + $0x130] sm:$0xff] }
  0x1e   :  { %953 = vmatpush1.bf16.msra.mxu0 %v2771_v59  ;;  %1056 = vmatpush1.bf16.msra.mxu1 %v2773_v60  ;;  %v2828_v45 = vcombine.high %v150_v39, %v154_v40  ;;  %v2830_v46 = vcombine.high %v151_v41, %v155_v42  ;;  %v158_v47 = vld [vmem:[%s4566_s1 + $0x380] sm:$0xff]  ;;  %v159_v49 = vld [vmem:[%s4566_s1 + $0x388] sm:$0xff]  ;;  %v2827_v51 = vcombine.low %v150_v39, %v154_v40  ;;  %v85_v39 = vld [vmem:[%s4566_s1 + $0x138] sm:$0xff] }
  0x1f   :  { %954 = vmatprep.subr.bf16.mxu0 %v2780_v61  ;;  %1057 = vmatprep.subr.bf16.mxu1 %v2782_v62  ;;  %v162_v48 = vld [vmem:[%s4566_s1 + $0x3a0] sm:$0xff]  ;;  %v163_v50 = vld [vmem:[%s4566_s1 + $0x3a8] sm:$0xff]  ;;  %v2829_v53 = vcombine.low %v151_v41, %v155_v42  ;;  %v48_v61 = vld [vmem:[%s4566_s1 + $0x10] sm:$0xff] }
  0x20   :  { %v166_v52 = vld [vmem:[%s4566_s1 + $0x3c0] sm:$0xff]  ;;  %v2836_v54 = vcombine.high %v158_v47, %v162_v48  ;;  %v2838_v57 = vcombine.high %v159_v49, %v163_v50  ;;  %v167_v58 = vld [vmem:[%s4566_s1 + $0x3c8] sm:$0xff]  ;;  %v2835_v60 = vcombine.low %v158_v47, %v162_v48  ;;  %v2837_v62 = vcombine.low %v159_v49, %v163_v50  ;;  %v88_v41 = vld [vmem:[%s4566_s1 + $0x150] sm:$0xff] }
  0x21   :  { %v170_v55 = vld [vmem:[%s4566_s1 + $0x3e0] sm:$0xff]  ;;  %v171_v59 = vld [vmem:[%s4566_s1 + $0x3e8] sm:$0xff]  ;;  %v2728_v8 = vcombine.high %v48_v61, %v52_v0  ;;  %v92_v42 = vld [vmem:[%s4566_s1 + $0x170] sm:$0xff]  ;;  %v2759_v49 = vcombine.low %v80_v33, %v84_v34 }
  0x22   :  { %955 = vmatpush1.bf16.msra.mxu0 %v2779_v3  ;;  %1058 = vmatpush1.bf16.msra.mxu1 %v2781_v4  ;;  %v2844_v63 = vcombine.high %v166_v52, %v170_v55  ;;  %v2846_v1 = vcombine.high %v167_v58, %v171_v59  ;;  %v53_v3 = vld [vmem:[%s4566_s1 + $0x38] sm:$0xff]  ;;  %v2843_v4 = vcombine.low %v166_v52, %v170_v55  ;;  %v3500_v7 = vld [vmem:[%s4567_s0] ss:$8 sps:$4 sm:$0xff]   ;;  %v3552_v32 = vld [vmem:[%s4567_s0 + $0x24] ss:$8 sps:$4 sm:$0xff]  }
  0x23   :  { %956 = vmatprep.subr.bf16.mxu0 %v2788_v5  ;;  %1059 = vmatprep.subr.bf16.mxu1 %v2790_v6  ;;  %v56_v5 = vld [vmem:[%s4566_s1 + $0x50] sm:$0xff]  ;;  %v2845_v6 = vcombine.low %v167_v58, %v171_v59  ;;  %v2730_v10 = vcombine.high %v49_v2, %v53_v3  ;;  %v2729_v16 = vcombine.low %v49_v2, %v53_v3  ;;  %v93_v47 = vld [vmem:[%s4566_s1 + $0x178] sm:$0xff] }
  0x24   :  { %v2736_v17 = vcombine.high %v56_v5, %v60_v9  ;;  %v3590_v50 = vld [vmem:[%s4567_s0 + $0x34] ss:$8 sps:$4 sm:$0xff]   ;;  %v2767_v59 = vcombine.low %v88_v41, %v92_v42 }
  0x25   :  { %v100_v52 = vld [vmem:[%s4566_s1 + $0x1b0] sm:$0xff]  ;;  %v97_v55 = vld [vmem:[%s4566_s1 + $0x198] sm:$0xff] }
  0x26   :  { %957 = vmatpush1.bf16.msra.mxu0 %v2787_v11  ;;  %1060 = vmatpush1.bf16.msra.mxu1 %v2789_v12  ;;  %v57_v11 = vld [vmem:[%s4566_s1 + $0x58] sm:$0xff] }
  0x27   :  { %958 = vmatprep.subr.bf16.mxu0 %v2796_v13  ;;  %1061 = vmatprep.subr.bf16.mxu1 %v2798_v14  ;;  %v61_v12 = vld [vmem:[%s4566_s1 + $0x78] sm:$0xff]  ;;  %v2727_v13 = vcombine.low %v48_v61, %v52_v0  ;;  %v108_v61 = vld [vmem:[%s4566_s1 + $0x1f0] sm:$0xff] }
  0x28   :  { %v3514_v14 = vld [vmem:[%s4567_s0 + $0x14] ss:$8 sps:$4 sm:$0xff]   ;;  %v2737_v24 = vcombine.low %v57_v11, %v61_v12 }
  0x29   :  { %v109_v2 = vld [vmem:[%s4566_s1 + $0x1f8] sm:$0xff] }
  0x2a   :  { %959 = vmatpush1.bf16.msra.mxu0 %v2795_v19  ;;  %1062 = vmatpush1.bf16.msra.mxu1 %v2797_v20  ;;  %v2738_v19 = vcombine.high %v57_v11, %v61_v12  ;;  %v65_v20 = vld [vmem:[%s4566_s1 + $0x98] sm:$0xff] }
  0x2b   :  { %960 = vmatprep.subr.bf16.mxu0 %v2804_v21  ;;  %1063 = vmatprep.subr.bf16.mxu1 %v2806_v22  ;;  %v69_v21 = vld [vmem:[%s4566_s1 + $0xb8] sm:$0xff]  ;;  %v2735_v22 = vcombine.low %v56_v5, %v60_v9  ;;  %v3628_v5 = vld [vmem:[%s4567_s0 + $0x44] ss:$8 sps:$4 sm:$0xff]  }
  0x2c   :  { %v113_v11 = vld [vmem:[%s4566_s1 + $0x218] sm:$0xff] }
  0x2d   :  { %v117_v12 = vld [vmem:[%s4566_s1 + $0x238] sm:$0xff] }
  0x2e   :  { %961 = vmatpush1.bf16.msra.mxu0 %v2803_v27  ;;  %1064 = vmatpush1.bf16.msra.mxu1 %v2805_v28  ;;  %v76_v27 = vld [vmem:[%s4566_s1 + $0xf0] sm:$0xff]  ;;  %v2746_v28 = vcombine.high %v65_v20, %v69_v21 }
  0x2f   :  { %962 = vmatprep.subr.bf16.mxu0 %v2812_v29  ;;  %1065 = vmatprep.subr.bf16.mxu1 %v2814_v30  ;;  %v73_v29 = vld [vmem:[%s4566_s1 + $0xd8] sm:$0xff]  ;;  %v2751_v40 = vcombine.low %v72_v23, %v76_v27 }
  0x30   :  { %v77_v30 = vld [vmem:[%s4566_s1 + $0xf8] sm:$0xff] }
  0x32   :  { %963 = vmatpush1.bf16.msra.mxu0 %v2811_v35  ;;  %1066 = vmatpush1.bf16.msra.mxu1 %v2813_v36  ;;  %v2745_v35 = vcombine.low %v65_v20, %v69_v21  ;;  %v2752_v36 = vcombine.high %v72_v23, %v76_v27  ;;  %v121_v21 = vld [vmem:[%s4566_s1 + $0x258] sm:$0xff]  ;;  %v2794_v23 = vcombine.high %v113_v11, %v117_v12  ;;  %v128_v27 = vld [vmem:[%s4566_s1 + $0x290] sm:$0xff] }
  0x33   :  { %964 = vmatprep.subr.bf16.mxu0 %v2820_v37  ;;  %1067 = vmatprep.subr.bf16.mxu1 %v2822_v38  ;;  %v81_v37 = vld [vmem:[%s4566_s1 + $0x118] sm:$0xff]  ;;  %v2754_v38 = vcombine.high %v73_v29, %v77_v30 }
  0x34   :  { %v2762_v48 = vcombine.high %v81_v37, %v85_v39 }
  0x36   :  { %965 = vmatpush1.bf16.msra.mxu0 %v2819_v43  ;;  %1068 = vmatpush1.bf16.msra.mxu1 %v2821_v44  ;;  %v2753_v43 = vcombine.low %v73_v29, %v77_v30  ;;  %v3577_v44 = vld [vmem:[%s4567_s0 + $0x20] ss:$8 sps:$4 sm:$0xff]   ;;  %v2793_v29 = vcombine.low %v113_v11, %v117_v12  ;;  %v165_v11 = vld [vmem:[%s4566_s1 + $0x3b8] sm:$0xff] }
  0x37   :  { %966 = vmatprep.subr.bf16.mxu0 %v2828_v45  ;;  %1069 = vmatprep.subr.bf16.mxu1 %v2830_v46  ;;  %v2760_v45 = vcombine.high %v80_v33, %v84_v34  ;;  %v89_v46 = vld [vmem:[%s4566_s1 + $0x158] sm:$0xff] }
  0x38   :  { %v2770_v58 = vcombine.high %v89_v46, %v93_v47  ;;  %v133_v33 = vld [vmem:[%s4566_s1 + $0x2b8] sm:$0xff] }
  0x3a   :  { %967 = vmatpush1.bf16.msra.mxu0 %v2827_v51  ;;  %1070 = vmatpush1.bf16.msra.mxu1 %v2829_v53  ;;  %v96_v51 = vld [vmem:[%s4566_s1 + $0x190] sm:$0xff]  ;;  %v2761_v53 = vcombine.low %v81_v37, %v85_v39 }
  0x3b   :  { %968 = vmatprep.subr.bf16.mxu0 %v2836_v54  ;;  %1071 = vmatprep.subr.bf16.mxu1 %v2838_v57  ;;  %v2768_v54 = vcombine.high %v88_v41, %v92_v42  ;;  %v101_v57 = vld [vmem:[%s4566_s1 + $0x1b8] sm:$0xff]  ;;  %v2776_v0 = vcombine.high %v96_v51, %v100_v52  ;;  %v140_v37 = vld [vmem:[%s4566_s1 + $0x2f0] sm:$0xff] }
  0x3c   :  { %v2778_v3 = vcombine.high %v97_v55, %v101_v57  ;;  %v2777_v9 = vcombine.low %v97_v55, %v101_v57  ;;  %v3693_v41 = vld [vmem:[%s4567_s0 + $0x50] ss:$8 sps:$4 sm:$0xff]  }
  0x3d   :  { %v137_v42 = vld [vmem:[%s4566_s1 + $0x2d8] sm:$0xff] }
  0x3e   :  { %969 = vmatpush1.bf16.msra.mxu0 %v2835_v60  ;;  %1072 = vmatpush1.bf16.msra.mxu1 %v2837_v62  ;;  %v104_v60 = vld [vmem:[%s4566_s1 + $0x1d0] sm:$0xff]  ;;  %v2769_v62 = vcombine.low %v89_v46, %v93_v47 }
  0x3f   :  { %970 = vmatprep.subr.bf16.mxu0 %v2844_v63  ;;  %1073 = vmatprep.subr.bf16.mxu1 %v2846_v1  ;;  %v3615_v63 = vld [vmem:[%s4567_s0 + $0x30] ss:$8 sps:$4 sm:$0xff]   ;;  %v2783_v15 = vcombine.low %v104_v60, %v108_v61 }
  0x40   :  { %v105_v1 = vld [vmem:[%s4566_s1 + $0x1d8] sm:$0xff] }
  0x41   :  { %v2785_v18 = vcombine.low %v105_v1, %v109_v2 }
  0x42   :  { %971 = vmatpush1.bf16.msra.mxu0 %v2843_v4  ;;  %1074 = vmatpush1.bf16.msra.mxu1 %v2845_v6  ;;  %v2775_v4 = vcombine.low %v96_v51, %v100_v52  ;;  %v112_v6 = vld [vmem:[%s4566_s1 + $0x210] sm:$0xff] }
  0x43   :  { %1146 = vmatprep.subr.bf16.mxu0 %v2728_v8  ;;  %1249 = vmatprep.subr.bf16.mxu1 %v2730_v10  ;;  %v116_v8 = vld [vmem:[%s4566_s1 + $0x230] sm:$0xff]  ;;  %v2784_v10 = vcombine.high %v104_v60, %v108_v61 }
  0x44   :  { %v2792_v20 = vcombine.high %v112_v6, %v116_v8  ;;  %v144_v51 = vld [vmem:[%s4566_s1 + $0x310] sm:$0xff] }
  0x45   :  { %973 = vmatmul.mubr.bf16.vlgmr.msra.gmra.mrb[0].mxu0 %v3500_v7  ;;  %1076 = vmatmul.mubr.bf16.vlgmr.msra.gmra.mrb[0].mxu1 %v3500_v7  ;;  %v148_v52 = vld [vmem:[%s4566_s1 + $0x330] sm:$0xff] }
  0x46   :  { %1147 = vmatpush1.bf16.msra.mxu0 %v2727_v13  ;;  %1250 = vmatpush1.bf16.msra.mxu1 %v2729_v16  ;;  %v2786_v13 = vcombine.high %v105_v1, %v109_v2  ;;  %v120_v16 = vld [vmem:[%s4566_s1 + $0x250] sm:$0xff]  ;;  %v157_v1 = vld [vmem:[%s4566_s1 + $0x378] sm:$0xff]  ;;  %v2823_v2 = vcombine.low %v144_v51, %v148_v52 }
  0x47   :  { %1148 = vmatprep.subr.bf16.mxu0 %v2736_v17  ;;  %1251 = vmatprep.subr.bf16.mxu1 %v2738_v19  ;;  %v124_v17 = vld [vmem:[%s4566_s1 + $0x270] sm:$0xff]  ;;  %v3653_v19 = vld [vmem:[%s4567_s0 + $0x40] ss:$8 sps:$4 sm:$0xff]  }
  0x48   :  { %982 = vmatprep.mubr.bf16.mxu0 %v3514_v14  ;;  %1085 = vmatprep.mubr.bf16.mxu1 %v3514_v14  ;;  %v2800_v30 = vcombine.high %v120_v16, %v124_v17  ;;  %v152_v60 = vld [vmem:[%s4566_s1 + $0x350] sm:$0xff] }
  0x49   :  { %v156_v61 = vld [vmem:[%s4566_s1 + $0x370] sm:$0xff] }
  0x4a   :  { %1149 = vmatpush1.bf16.msra.mxu0 %v2735_v22  ;;  %1252 = vmatpush1.bf16.msra.mxu1 %v2737_v24  ;;  %v125_v22 = vld [vmem:[%s4566_s1 + $0x278] sm:$0xff]  ;;  %v2791_v24 = vcombine.low %v112_v6, %v116_v8  ;;  %v160_v8 = vld [vmem:[%s4566_s1 + $0x390] sm:$0xff]  ;;  %v2831_v12 = vcombine.low %v152_v60, %v156_v61 }
  0x4b   :  { %1150 = vmatprep.subr.bf16.mxu0 %v2744_v26  ;;  %1253 = vmatprep.subr.bf16.mxu1 %v2746_v28  ;;  %v3666_v26 = vld [vmem:[%s4567_s0 + $0x54] ss:$8 sps:$4 sm:$0xff]   ;;  %v2802_v34 = vcombine.high %v121_v21, %v125_v22 }
  0x4c   :  { %v132_v28 = vld [vmem:[%s4566_s1 + $0x2b0] sm:$0xff] }
  0x4d   :  { %983 = vmatmul.mubr.bf16.gmra.mrb[4].mxu0 %v3536_v25  ;;  %1086 = vmatmul.mubr.bf16.gmra.mrb[4].mxu1 %v3536_v25  ;;  %v2808_v39 = vcombine.high %v128_v27, %v132_v28 }
  0x4e   :  { %1151 = vmatpush1.bf16.msra.mxu0 %v2743_v31  ;;  %1254 = vmatpush1.bf16.msra.mxu1 %v2745_v35  ;;  %v129_v31 = vld [vmem:[%s4566_s1 + $0x298] sm:$0xff]  ;;  %v2799_v35 = vcombine.low %v120_v16, %v124_v17  ;;  %v168_v17 = vld [vmem:[%s4566_s1 + $0x3d0] sm:$0xff] }
  0x4f   :  { %1152 = vmatprep.subr.bf16.mxu0 %v2752_v36  ;;  %1255 = vmatprep.subr.bf16.mxu1 %v2754_v38  ;;  %v136_v36 = vld [vmem:[%s4566_s1 + $0x2d0] sm:$0xff]  ;;  %v2801_v38 = vcombine.low %v121_v21, %v125_v22  ;;  %v2809_v46 = vcombine.low %v129_v31, %v133_v33  ;;  %v173_v21 = vld [vmem:[%s4566_s1 + $0x3f8] sm:$0xff] }
  0x50   :  { %992 = vmatprep.mubr.bf16.mxu0 %v3552_v32  ;;  %1095 = vmatprep.mubr.bf16.mxu1 %v3552_v32  ;;  %v2816_v47 = vcombine.high %v136_v36, %v140_v37  ;;  %v2815_v55 = vcombine.low %v136_v36, %v140_v37  ;;  %v3176_v36 = vld [vmem:[%s4568_s2 + $0x8] sm:$0xff]  }
  0x51   :  { %v3178_v37 = vld [vmem:[%s4568_s2 + $0x88] sm:$0xff]  }
  0x52   :  { %1153 = vmatpush1.bf16.msra.mxu0 %v2751_v40  ;;  %1256 = vmatpush1.bf16.msra.mxu1 %v2753_v43  ;;  %v2810_v40 = vcombine.high %v129_v31, %v133_v33  ;;  %v141_v43 = vld [vmem:[%s4566_s1 + $0x2f8] sm:$0xff]  ;;  %v3172_v31 = vld [vmem:[%s4568_s2] sm:$0xff]  }
  0x53   :  { %1154 = vmatprep.subr.bf16.mxu0 %v2760_v45  ;;  %1257 = vmatprep.subr.bf16.mxu1 %v2762_v48  ;;  %v2807_v45 = vcombine.low %v128_v27, %v132_v28  ;;  %v2818_v48 = vcombine.high %v137_v42, %v141_v43  ;;  %v2817_v57 = vcombine.low %v137_v42, %v141_v43  ;;  %v3174_v33 = vld [vmem:[%s4568_s2 + $0x80] sm:$0xff]   ;;  %v3185_v42 = vld [vmem:[%s4568_s2 + $0xd8] sm:$0xff]  }
  0x54   :  { %v3184_v43 = vld [vmem:[%s4568_s2 + $0x18] sm:$0xff]  }
  0x55   :  { %993 = vmatmul.mubr.bf16.gmra.mrb[8].mxu0 %v3577_v44  ;;  %1096 = vmatmul.mubr.bf16.gmra.mrb[8].mxu1 %v3577_v44 }
  0x56   :  { %1155 = vmatpush1.bf16.msra.mxu0 %v2759_v49  ;;  %1258 = vmatpush1.bf16.msra.mxu1 %v2761_v53  ;;  %v3704_v49 = vld [vmem:[%s4567_s0 + $0x64] ss:$8 sps:$4 sm:$0xff]   ;;  %v145_v53 = vld [vmem:[%s4566_s1 + $0x318] sm:$0xff] }
  0x57   :  { %1156 = vmatprep.subr.bf16.mxu0 %v2768_v54  ;;  %1259 = vmatprep.subr.bf16.mxu1 %v2770_v58  ;;  %v149_v54 = vld [vmem:[%s4566_s1 + $0x338] sm:$0xff]  ;;  %v2824_v58 = vcombine.high %v144_v51, %v148_v52  ;;  %v3193_v51 = vld [vmem:[%s4568_s2 + $0xe8] sm:$0xff]  }
  0x58   :  { %1002 = vmatprep.mubr.bf16.mxu0 %v3590_v50  ;;  %1105 = vmatprep.mubr.bf16.mxu1 %v3590_v50  ;;  %v3192_v52 = vld [vmem:[%s4568_s2 + $0x28] sm:$0xff]  }
  0x5a   :  { %1157 = vmatpush1.bf16.msra.mxu0 %v2767_v59  ;;  %1260 = vmatpush1.bf16.msra.mxu1 %v2769_v62  ;;  %v2826_v59 = vcombine.high %v145_v53, %v149_v54  ;;  %v3731_v62 = vld [vmem:[%s4567_s0 + $0x60] ss:$8 sps:$4 sm:$0xff]  }
  0x5b   :  { %1158 = vmatprep.subr.bf16.mxu0 %v2776_v0  ;;  %1261 = vmatprep.subr.bf16.mxu1 %v2778_v3  ;;  %v153_v0 = vld [vmem:[%s4566_s1 + $0x358] sm:$0xff]  ;;  %v2825_v3 = vcombine.low %v145_v53, %v149_v54  ;;  %v3194_v53 = vld [vmem:[%s4568_s2 + $0xa8] sm:$0xff]   ;;  %v3197_v54 = vld [vmem:[%s4568_s2 + $0x30] sm:$0xff]  }
  0x5c   :  { %v2834_v6 = vcombine.high %v153_v0, %v157_v1 }
  0x5d   :  { %1003 = vmatmul.mubr.bf16.gmra.mrb[12].mxu0 %v3615_v63  ;;  %1106 = vmatmul.mubr.bf16.gmra.mrb[12].mxu1 %v3615_v63 }
  0x5e   :  { %1159 = vmatpush1.bf16.msra.mxu0 %v2775_v4  ;;  %1262 = vmatpush1.bf16.msra.mxu1 %v2777_v9  ;;  %v2832_v4 = vcombine.high %v152_v60, %v156_v61  ;;  %v164_v9 = vld [vmem:[%s4566_s1 + $0x3b0] sm:$0xff]  ;;  %v3913_v61 = vld [vmem:[%s4569_s3 + $0x18] sm:$0xff] }
  0x5f   :  { %1160 = vmatprep.subr.bf16.mxu0 %v2784_v10  ;;  %1263 = vmatprep.subr.bf16.mxu1 %v2786_v13  ;;  %v161_v10 = vld [vmem:[%s4566_s1 + $0x398] sm:$0xff]  ;;  %v2833_v13 = vcombine.low %v153_v0, %v157_v1  ;;  %v2839_v22 = vcombine.low %v160_v8, %v164_v9 }
  0x60   :  { %1012 = vmatprep.mubr.bf16.mxu0 %v3628_v5  ;;  %1115 = vmatprep.mubr.bf16.mxu1 %v3628_v5  ;;  %v2842_v16 = vcombine.high %v161_v10, %v165_v11 }
  0x62   :  { %1161 = vmatpush1.bf16.msra.mxu0 %v2783_v15  ;;  %1264 = vmatpush1.bf16.msra.mxu1 %v2785_v18  ;;  %v2840_v15 = vcombine.high %v160_v8, %v164_v9  ;;  %v172_v18 = vld [vmem:[%s4566_s1 + $0x3f0] sm:$0xff] }
  0x63   :  { %1162 = vmatprep.subr.bf16.mxu0 %v2792_v20  ;;  %1265 = vmatprep.subr.bf16.mxu1 %v2794_v23  ;;  %v169_v20 = vld [vmem:[%s4566_s1 + $0x3d8] sm:$0xff]  ;;  %v2841_v23 = vcombine.low %v161_v10, %v165_v11  ;;  %v2847_v28 = vcombine.low %v168_v17, %v172_v18 }
  0x64   :  { %v2850_v27 = vcombine.high %v169_v20, %v173_v21  ;;  %v3936_v11 = vld [vmem:[%s4569_s3 + $0x58] sm:$0xff] }
  0x65   :  { %1013 = vmatmul.mubr.bf16.gmra.mrb[16].mxu0 %v3653_v19  ;;  %1116 = vmatmul.mubr.bf16.gmra.mrb[16].mxu1 %v3653_v19 }
  0x66   :  { %1163 = vmatpush1.bf16.msra.mxu0 %v2791_v24  ;;  %1266 = vmatpush1.bf16.msra.mxu1 %v2793_v29  ;;  %v2848_v24 = vcombine.high %v168_v17, %v172_v18  ;;  %v2849_v29 = vcombine.low %v169_v20, %v173_v21 }
  0x67   :  { %1164 = vmatprep.subr.bf16.mxu0 %v2800_v30  ;;  %1267 = vmatprep.subr.bf16.mxu1 %v2802_v34  ;;  %v3171_v30 = vld [vmem:[%s4568_s2 + $0x40] sm:$0xff]   ;;  %v3175_v34 = vld [vmem:[%s4568_s2 + $0x48] sm:$0xff]  }
  0x68   :  { %1022 = vmatprep.mubr.bf16.mxu0 %v3666_v26  ;;  %1125 = vmatprep.mubr.bf16.mxu1 %v3666_v26 }
  0x6a   :  { %1165 = vmatpush1.bf16.msra.mxu0 %v2799_v35  ;;  %1268 = vmatpush1.bf16.msra.mxu1 %v2801_v38  ;;  %v3177_v35 = vld [vmem:[%s4568_s2 + $0xc8] sm:$0xff]   ;;  %v3179_v38 = vld [vmem:[%s4568_s2 + $0x50] sm:$0xff]  }
  0x6b   :  { %1166 = vmatprep.subr.bf16.mxu0 %v2808_v39  ;;  %1269 = vmatprep.subr.bf16.mxu1 %v2810_v40  ;;  %v3182_v39 = vld [vmem:[%s4568_s2 + $0x90] sm:$0xff]   ;;  %v3183_v40 = vld [vmem:[%s4568_s2 + $0x58] sm:$0xff]  }
  0x6d   :  { %1023 = vmatmul.mubr.bf16.gmra.mrb[20].mxu0 %v3693_v41  ;;  %1126 = vmatmul.mubr.bf16.gmra.mrb[20].mxu1 %v3693_v41 }
  0x6e   :  { %1167 = vmatpush1.bf16.msra.mxu0 %v2807_v45  ;;  %1270 = vmatpush1.bf16.msra.mxu1 %v2809_v46  ;;  %v3186_v45 = vld [vmem:[%s4568_s2 + $0x98] sm:$0xff]   ;;  %v3187_v46 = vld [vmem:[%s4568_s2 + $0x60] sm:$0xff]  }
  0x6f   :  { %1168 = vmatprep.subr.bf16.mxu0 %v2816_v47  ;;  %1271 = vmatprep.subr.bf16.mxu1 %v2818_v48  ;;  %v3190_v47 = vld [vmem:[%s4568_s2 + $0xa0] sm:$0xff]   ;;  %v3191_v48 = vld [vmem:[%s4568_s2 + $0x68] sm:$0xff]  }
  0x70   :  { %1032 = vmatprep.mubr.bf16.mxu0 %v3704_v49  ;;  %1135 = vmatprep.mubr.bf16.mxu1 %v3704_v49 }
  0x72   :  { %1169 = vmatpush1.bf16.msra.mxu0 %v2815_v55  ;;  %1272 = vmatpush1.bf16.msra.mxu1 %v2817_v57  ;;  %v3198_v55 = vld [vmem:[%s4568_s2 + $0xb0] sm:$0xff]   ;;  %v3199_v57 = vld [vmem:[%s4568_s2 + $0x78] sm:$0xff]  }
  0x73   :  { %1170 = vmatprep.subr.bf16.mxu0 %v2824_v58  ;;  %1273 = vmatprep.subr.bf16.mxu1 %v2826_v59  ;;  %v3200_v58 = vld [vmem:[%s4568_s2 + $0xf8] sm:$0xff]   ;;  %v3203_v59 = vld [vmem:[%s4568_s2 + $0x140] sm:$0xff]  }
  0x75   :  { %1033 = vmatmul.mubr.bf16.gmra.mrb[24].mxu0 %v3731_v62  ;;  %1136 = vmatmul.mubr.bf16.gmra.mrb[24].mxu1 %v3731_v62 }
  0x76   :  { %1171 = vmatpush1.bf16.msra.mxu0 %v2823_v2  ;;  %1274 = vmatpush1.bf16.msra.mxu1 %v2825_v3  ;;  %v3924_v3 = vld [vmem:[%s4569_s3 + $0x50] sm:$0xff] }
  0x77   :  { %1172 = vmatprep.subr.bf16.mxu0 %v2832_v4  ;;  %1275 = vmatprep.subr.bf16.mxu1 %v2834_v6  ;;  %v3929_v4 = vld [vmem:[%s4569_s3 + $0x48] sm:$0xff] }
  0x78   :  { %1178 = vmatprep.mubr.bf16.mxu0 %v3376_v56  ;;  %1281 = vmatprep.mubr.bf16.mxu1 %v3376_v56  ;;  %v3173_v56 = vld [vmem:[%s4568_s2 + $0xc0] sm:$0xff]  }
  0x7a   :  { %1173 = vmatpush1.bf16.msra.mxu0 %v2831_v12  ;;  %1276 = vmatpush1.bf16.msra.mxu1 %v2833_v13 }
  0x7b   :  { %1174 = vmatprep.subr.bf16.mxu0 %v2840_v15  ;;  %1277 = vmatprep.subr.bf16.mxu1 %v2842_v16 }
  0x7e   :  { %1175 = vmatpush1.bf16.msra.mxu0 %v2839_v22  ;;  %1278 = vmatpush1.bf16.msra.mxu1 %v2841_v23 }
  0x7f   :  { %1176 = vmatprep.subr.bf16.mxu0 %v2848_v24  ;;  %1279 = vmatprep.subr.bf16.mxu1 %v2850_v27 }
  0x82   :  { %1177 = vmatpush1.bf16.msra.mxu0 %v2847_v28  ;;  %1280 = vmatpush1.bf16.msra.mxu1 %v2849_v29 }
  0x83   :  { %2915 = vmatprep.subr.bf16.mxu0 %v3171_v30  ;;  %2973 = vmatprep.subr.bf16.mxu1 %v3173_v56 }
  0x85   :  { %1179 = vmatmul.mubr.bf16.vlgmr.msra.gmra.mrb[28].mxu0 %v3500_v7  ;;  %1282 = vmatmul.mubr.bf16.vlgmr.msra.gmra.mrb[28].mxu1 %v3500_v7  ;;  %v3181_v7 = vld [vmem:[%s4568_s2 + $0xd0] sm:$0xff]  }
  0x86   :  { %1188 = vmatprep.mubr.bf16.mxu0 %v3514_v14  ;;  %1291 = vmatprep.mubr.bf16.mxu1 %v3514_v14  ;;  %v3180_v14 = vld [vmem:[%s4568_s2 + $0x10] sm:$0xff]  }
  0x87   :  { %2916 = vmatpush3.bf16.msra.mxu0 %v3172_v31  ;;  %2974 = vmatpush3.bf16.msra.mxu1 %v3174_v33  ;;  %v3946_v31 = vld [vmem:[%s4569_s3 + $0x80] sm:$0xff] }
  0x88   :  { %2917 = vmatprep.subr.bf16.mxu0 %v3175_v34  ;;  %2975 = vmatprep.subr.bf16.mxu1 %v3177_v35 }
  0x8b   :  { %2918 = vmatpush3.bf16.msra.mxu0 %v3176_v36  ;;  %2976 = vmatpush3.bf16.msra.mxu1 %v3178_v37  ;;  %v3951_v36 = vld [vmem:[%s4569_s3 + $0x90] sm:$0xff]  ;;  %v3956_v37 = vld [vmem:[%s4569_s3 + $0x88] sm:$0xff] }
  0x8c   :  { %2919 = vmatprep.subr.bf16.mxu0 %v3179_v38  ;;  %2977 = vmatprep.subr.bf16.mxu1 %v3181_v7 }
  0x8d   :  { %1189 = vmatmul.mubr.bf16.gmra.mrb[32].mxu0 %v3536_v25  ;;  %1292 = vmatmul.mubr.bf16.gmra.mrb[32].mxu1 %v3536_v25  ;;  %v3189_v25 = vld [vmem:[%s4568_s2 + $0xe0] sm:$0xff]  }
  0x8e   :  { %1198 = vmatprep.mubr.bf16.mxu0 %v3552_v32  ;;  %1301 = vmatprep.mubr.bf16.mxu1 %v3552_v32  ;;  %v3188_v32 = vld [vmem:[%s4568_s2 + $0x20] sm:$0xff]  }
  0x8f   :  { %2920 = vmatpush3.bf16.msra.mxu0 %v3180_v14  ;;  %2978 = vmatpush3.bf16.msra.mxu1 %v3182_v39 }
  0x90   :  { %2921 = vmatprep.subr.bf16.mxu0 %v3183_v40  ;;  %2979 = vmatprep.subr.bf16.mxu1 %v3185_v42  ;;  %v3961_v40 = vld [vmem:[%s4569_s3 + $0x98] sm:$0xff]  ;;  %v3966_v42 = vld [vmem:[%s4569_s3 + $0xc0] sm:$0xff] }
  0x93   :  { %2922 = vmatpush3.bf16.msra.mxu0 %v3184_v43  ;;  %2980 = vmatpush3.bf16.msra.mxu1 %v3186_v45 }
  0x94   :  { %2923 = vmatprep.subr.bf16.mxu0 %v3187_v46  ;;  %2981 = vmatprep.subr.bf16.mxu1 %v3189_v25 }
  0x95   :  { %1199 = vmatmul.mubr.bf16.gmra.mrb[36].mxu0 %v3577_v44  ;;  %1302 = vmatmul.mubr.bf16.gmra.mrb[36].mxu1 %v3577_v44  ;;  %v3195_v44 = vld [vmem:[%s4568_s2 + $0x70] sm:$0xff]  }
  0x96   :  { %1208 = vmatprep.mubr.bf16.mxu0 %v3590_v50  ;;  %1311 = vmatprep.mubr.bf16.mxu1 %v3590_v50  ;;  %v3196_v50 = vld [vmem:[%s4568_s2 + $0xf0] sm:$0xff]  }
  0x97   :  { %2924 = vmatpush3.bf16.msra.mxu0 %v3188_v32  ;;  %2982 = vmatpush3.bf16.msra.mxu1 %v3190_v47 }
  0x98   :  { %2925 = vmatprep.subr.bf16.mxu0 %v3191_v48  ;;  %2983 = vmatprep.subr.bf16.mxu1 %v3193_v51  ;;  %v3974_v48 = vld [vmem:[%s4569_s3 + $0xd0] sm:$0xff]  ;;  %v3979_v51 = vld [vmem:[%s4569_s3 + $0xc8] sm:$0xff] }
  0x9b   :  { %2926 = vmatpush3.bf16.msra.mxu0 %v3192_v52  ;;  %2984 = vmatpush3.bf16.msra.mxu1 %v3194_v53 }
  0x9c   :  { %2927 = vmatprep.subr.bf16.mxu0 %v3195_v44  ;;  %2985 = vmatprep.subr.bf16.mxu1 %v3196_v50 }
  0x9d   :  { %1209 = vmatmul.mubr.bf16.gmra.mrb[40].mxu0 %v3615_v63  ;;  %1312 = vmatmul.mubr.bf16.gmra.mrb[40].mxu1 %v3615_v63  ;;  %v3201_v63 = vld [vmem:[%s4568_s2 + $0x38] sm:$0xff]  }
  0x9e   :  { %1218 = vmatprep.mubr.bf16.mxu0 %v3628_v5  ;;  %1321 = vmatprep.mubr.bf16.mxu1 %v3628_v5  ;;  %v3202_v5 = vld [vmem:[%s4568_s2 + $0xb8] sm:$0xff]  }
  0x9f   :  { %2928 = vmatpush3.bf16.msra.mxu0 %v3197_v54  ;;  %2986 = vmatpush3.bf16.msra.mxu1 %v3198_v55  ;;  %v3990_v55 = vld [vmem:[%s4569_s3 + $0xd8] sm:$0xff] }
  0xa0   :  { %2929 = vmatprep.subr.bf16.mxu0 %v3199_v57  ;;  %2987 = vmatprep.subr.bf16.mxu1 %v3200_v58  ;;  %v3204_v58 = vld [vmem:[%s4568_s2 + $0x100] sm:$0xff]  }
  0xa3   :  { %2930 = vmatpush3.bf16.msra.mxu0 %v3201_v63  ;;  %2988 = vmatpush3.bf16.msra.mxu1 %v3202_v5 }
  0xa4   :  { %3031 = vmatprep.subr.bf16.mxu0 %v3203_v59 }
  0xa5   :  { %1219 = vmatmul.mubr.bf16.gmra.mrb[44].mxu0 %v3653_v19  ;;  %1322 = vmatmul.mubr.bf16.gmra.mrb[44].mxu1 %v3653_v19  ;;  %v3205_v19 = vld [vmem:[%s4568_s2 + $0x1c0] sm:$0xff]  }
  0xa6   :  { %1228 = vmatprep.mubr.bf16.mxu0 %v3666_v26  ;;  %1331 = vmatprep.mubr.bf16.mxu1 %v3666_v26  ;;  %v3898_v26 = vld [vmem:[%s4569_s3] sm:$0xff] }
  0xa7   :  { %3089 = vmatprep.subr.bf16.mxu1 %v3205_v19 }
  0xad   :  { %1229 = vmatmul.mubr.bf16.gmra.mrb[48].mxu0 %v3693_v41  ;;  %1332 = vmatmul.mubr.bf16.gmra.mrb[48].mxu1 %v3693_v41  ;;  %v3903_v41 = vld [vmem:[%s4569_s3 + $0x10] sm:$0xff] }
  0xae   :  { %1238 = vmatprep.mubr.bf16.mxu0 %v3704_v49  ;;  %1341 = vmatprep.mubr.bf16.mxu1 %v3704_v49  ;;  %v3908_v49 = vld [vmem:[%s4569_s3 + $0x8] sm:$0xff] }
  0xb5   :  { %1239 = vmatmul.mubr.bf16.gmra.mrb[52].mxu0 %v3731_v62  ;;  %1342 = vmatmul.mubr.bf16.gmra.mrb[52].mxu1 %v3731_v62  ;;  %v3918_v62 = vld [vmem:[%s4569_s3 + $0x40] sm:$0xff] }
 0x118   :  { %v974_v60 = vpop.f32.mrb[0].mxu0  ;;  %v1077_v1 = vpop.f32.mrb[0].mxu1 }
 0x119   :  { %v975_v0 = vadd.f32 %v974_v60, %v3898_v26  ;;  %v976_v2 = vpop.f32.mrb[1].mxu0  ;;  %v1078_v6 = vadd.f32 %v1077_v1, %v3903_v41  ;;  %v1079_v9 = vpop.f32.mrb[1].mxu1  ;;  %v3206_v1 = vld [vmem:[%s4568_s2 + $0x180] sm:$0xff]  }
 0x11a   :  { %v977_v8 = vadd.f32 %v976_v2, %v3908_v49  ;;  %v978_v10 = vpop.f32.mrb[2].mxu0  ;;  %v1080_v13 = vadd.f32 %v1079_v9, %v3913_v61  ;;  %v1081_v16 = vpop.f32.mrb[2].mxu1  ;;  %v3207_v2 = vld [vmem:[%s4568_s2 + $0x148] sm:$0xff]  }
 0x11b   :  { %v1352_v12 = vmul.f32 0.2, %v975_v0  ;;  %v979_v15 = vadd.f32 %v978_v10, %v3918_v62  ;;  %v980_v17 = vpop.f32.mrb[3].mxu0  ;;  %v1354_v18 = vmul.f32 0.2, %v1078_v6  ;;  %v1082_v21 = vadd.f32 %v1081_v16, %v3924_v3  ;;  %v1083_v23 = vpop.f32.mrb[3].mxu1 }
 0x11c   :  { %v1353_v20 = vmul.f32 0.2, %v977_v8  ;;  %v981_v22 = vadd.f32 %v980_v17, %v3929_v4  ;;  %v1355_v24 = vmul.f32 0.2, %v1080_v13  ;;  %v1084_v28 = vadd.f32 %v1083_v23, %v3936_v11 }
 0x11d   :  { %v1360_v27 = vmul.f32 0.2, %v979_v15  ;;  %v1466_v29 = vmax.f32 %v1078_v6, %v1354_v18  ;;  %v1362_v30 = vmul.f32 0.2, %v1082_v21  ;;  %v1464_v33 = vmax.f32 %v975_v0, %v1352_v12 }
 0x11e   :  { %v1361_v56 = vmul.f32 0.2, %v981_v22  ;;  %v1363_v35 = vmul.f32 0.2, %v1084_v28  ;;  %v1465_v38 = vmax.f32 %v977_v8, %v1353_v20  ;;  %v1467_v43 = vmax.f32 %v1080_v13, %v1355_v24  ;;  %v3209_v13 = vld [vmem:[%s4568_s2 + $0x1c8] sm:$0xff]   ;;  %v4019_v20 = vld [vmem:[%s4569_s3 + $0x100] sm:$0xff] }
 0x11f   :  { %v1472_v34 = vmax.f32 %v979_v15, %v1360_v27  ;;  %v1474_v7 = vmax.f32 %v1082_v21, %v1362_v30  ;;  %v4026_v27 = vld [vmem:[%s4569_s3 + $0x108] sm:$0xff] }
 0x120   :  { %v1473_v14 = vmax.f32 %v981_v22, %v1361_v56  ;;  %v984_v39 = vpop.f32.mrb[4].mxu0  ;;  %v1475_v46 = vmax.f32 %v1084_v28, %v1363_v35  ;;  %v1087_v32 = vpop.f32.mrb[4].mxu1  ;;  %v3208_v28 = vld [vmem:[%s4568_s2 + $0x108] sm:$0xff]   ;;  %v3211_v35 = vld [vmem:[%s4568_s2 + $0x150] sm:$0xff]  }
 0x121   :  { %v1576_v45 = vpack.c.bf16 %v1472_v34, %v1464_v33  ;;  %v3969_v25 = vadd.f32 %v984_v39, %v3946_v31  ;;  %v986_v47 = vpop.f32.mrb[5].mxu0  ;;  %v1578_v52 = vpack.c.bf16 %v1474_v7, %v1466_v29  ;;  %v3982_v53 = vadd.f32 %v1087_v32, %v3951_v36  ;;  %v1089_v50 = vpop.f32.mrb[5].mxu1  ;;  %v4035_v33 = vld [vmem:[%s4569_s3 + $0x110] sm:$0xff]  ;;  %v3210_v34 = vld [vmem:[%s4568_s2 + $0x188] sm:$0xff]   ;;  %v4046_v39 = vld [vmem:[%s4569_s3 + $0x118] sm:$0xff] }
 0x122   :  { %v3985_v44 = vadd.f32 %v986_v47, %v3956_v37  ;;  %v988_v54 = vpop.f32.mrb[6].mxu0  ;;  %v1577_v57 = vpack.c.bf16 %v1473_v14, %v1465_v38  ;;  %v3997_v5 = vadd.f32 %v1089_v50, %v3961_v40  ;;  %v1091_v19 = vpop.f32.mrb[6].mxu1  ;;  %v1579_v0 = vpack.c.bf16 %v1475_v46, %v1467_v43  ;;  %v4051_v43 = vld [vmem:[%s4569_s3 + $0x140] sm:$0xff] }
 0x123   :  { %v1368_v63 = vmul.f32 0.2, %v3969_v25  ;;  %v989_v59 = vadd.f32 %v988_v54, %v3966_v42  ;;  %v990_v60 = vpop.f32.mrb[7].mxu0  ;;  %v1370_v6 = vmul.f32 0.2, %v3982_v53  ;;  %v1092_v9 = vadd.f32 %v1091_v19, %v3974_v48  ;;  %v1093_v12 = vpop.f32.mrb[7].mxu1 }
 0x124   :  { %v1369_v8 = vmul.f32 0.2, %v3985_v44  ;;  %v991_v10 = vadd.f32 %v990_v60, %v3979_v51  ;;  %2176 = vmatprep.mubr.bf16.mxu0 %v1577_v57  ;;  %v1371_v16 = vmul.f32 0.2, %v3997_v5  ;;  %v1094_v18 = vadd.f32 %v1093_v12, %v3990_v55  ;;  %2265 = vmatprep.mubr.bf16.mxu1 %v1579_v0  ;;  %v3212_v19 = vld [vmem:[%s4568_s2 + $0x110] sm:$0xff]  }
 0x125   :  { %v1480_v15 = vmax.f32 %v3969_v25, %v1368_v63  ;;  %v1376_v17 = vmul.f32 0.2, %v989_v59  ;;  %2177 = vmatmul.mubr.bf16.vlgmr.msra.gmra.mrb[56].mxu0 %v1576_v45  ;;  %v1482_v21 = vmax.f32 %v3982_v53, %v1370_v6  ;;  %v1378_v23 = vmul.f32 0.2, %v1092_v9  ;;  %2266 = vmatmul.mubr.bf16.vlgmr.msra.gmra.mrb[56].mxu1 %v1578_v52  ;;  %v3213_v45 = vld [vmem:[%s4568_s2 + $0x1d0] sm:$0xff]   ;;  %v4067_v53 = vld [vmem:[%s4569_s3 + $0x148] sm:$0xff] }
 0x126   :  { %v1481_v22 = vmax.f32 %v3985_v44, %v1369_v8  ;;  %v1377_v24 = vmul.f32 0.2, %v991_v10  ;;  %3032 = vmatpush3.bf16.msra.mxu0 %v3204_v58  ;;  %v1483_v29 = vmax.f32 %v3997_v5, %v1371_v16  ;;  %v1379_v56 = vmul.f32 0.2, %v1094_v18  ;;  %3090 = vmatpush3.bf16.msra.mxu1 %v3206_v1  ;;  %v4062_v52 = vld [vmem:[%s4569_s3 + $0x150] sm:$0xff]  ;;  %v4078_v63 = vld [vmem:[%s4569_s3 + $0x158] sm:$0xff] }
 0x127   :  { %v1488_v30 = vmax.f32 %v989_v59, %v1376_v17  ;;  %3033 = vmatprep.subr.bf16.mxu0 %v3207_v2  ;;  %v1490_v38 = vmax.f32 %v1092_v9, %v1378_v23  ;;  %3091 = vmatprep.subr.bf16.mxu1 %v3209_v13  ;;  %v3214_v9 = vld [vmem:[%s4568_s2 + $0x190] sm:$0xff]  }
 0x128   :  { %v1489_v7 = vmax.f32 %v991_v10, %v1377_v24  ;;  %v994_v14 = vpop.f32.mrb[8].mxu0  ;;  %v1491_v46 = vmax.f32 %v1094_v18, %v1379_v56  ;;  %v1097_v32 = vpop.f32.mrb[8].mxu1  ;;  %v3215_v10 = vld [vmem:[%s4568_s2 + $0x158] sm:$0xff]  }
 0x129   :  { %v4057_v25 = vadd.f32 %v994_v14, %v4019_v20  ;;  %v996_v47 = vpop.f32.mrb[9].mxu0  ;;  %v1584_v44 = vpack.c.bf16 %v1488_v30, %v1480_v15  ;;  %v4070_v50 = vadd.f32 %v1097_v32, %v4035_v33  ;;  %v1099_v57 = vpop.f32.mrb[9].mxu1  ;;  %v1586_v59 = vpack.c.bf16 %v1490_v38, %v1482_v21  ;;  %v3217_v18 = vld [vmem:[%s4568_s2 + $0x1d8] sm:$0xff]   ;;  %v3219_v32 = vld [vmem:[%s4568_s2 + $0x160] sm:$0xff]  }
 0x12a   :  { %v4073_v54 = vadd.f32 %v996_v47, %v4026_v27  ;;  %v998_v58 = vpop.f32.mrb[10].mxu0  ;;  %v1585_v5 = vpack.c.bf16 %v1489_v7, %v1481_v22  ;;  %3034 = vmatpush3.bf16.msra.mxu0 %v3208_v28  ;;  %v4085_v0 = vadd.f32 %v1099_v57, %v4046_v39  ;;  %v1101_v2 = vpop.f32.mrb[10].mxu1  ;;  %v1587_v8 = vpack.c.bf16 %v1491_v46, %v1483_v29  ;;  %v4107_v28 = vld [vmem:[%s4569_s3 + $0x180] sm:$0xff]  ;;  %v3216_v38 = vld [vmem:[%s4568_s2 + $0x118] sm:$0xff]   ;;  %v4123_v46 = vld [vmem:[%s4569_s3 + $0x190] sm:$0xff] }
 0x12b   :  { %v1384_v60 = vmul.f32 0.2, %v4057_v25  ;;  %v999_v1 = vadd.f32 %v998_v58, %v4051_v43  ;;  %v1000_v6 = vpop.f32.mrb[11].mxu0  ;;  %3092 = vmatpush3.bf16.msra.mxu1 %v3210_v34  ;;  %3035 = vmatprep.subr.bf16.mxu0 %v3211_v35  ;;  %v1386_v12 = vmul.f32 0.2, %v4070_v50  ;;  %v1102_v15 = vadd.f32 %v1101_v2, %v4062_v52  ;;  %v1103_v17 = vpop.f32.mrb[11].mxu1 }
 0x12c   :  { %v1385_v13 = vmul.f32 0.2, %v4073_v54  ;;  %v1001_v16 = vadd.f32 %v1000_v6, %v4067_v53  ;;  %2184 = vmatprep.mubr.bf16.mxu0 %v1585_v5  ;;  %3093 = vmatprep.subr.bf16.mxu1 %v3213_v45  ;;  %v1387_v22 = vmul.f32 0.2, %v4085_v0  ;;  %v1104_v24 = vadd.f32 %v1103_v17, %v4078_v63  ;;  %v4114_v35 = vld [vmem:[%s4569_s3 + $0x188] sm:$0xff]  ;;  %v3221_v57 = vld [vmem:[%s4568_s2 + $0x1e0] sm:$0xff]  }
 0x12d   :  { %v1496_v21 = vmax.f32 %v4057_v25, %v1384_v60  ;;  %v1392_v23 = vmul.f32 0.2, %v999_v1  ;;  %2273 = vmatprep.mubr.bf16.mxu1 %v1587_v8  ;;  %2185 = vmatmul.mubr.bf16.gmra.mrb[60].mxu0 %v1584_v44  ;;  %v1498_v29 = vmax.f32 %v4070_v50, %v1386_v12  ;;  %v1394_v56 = vmul.f32 0.2, %v1102_v15  ;;  %v3218_v25 = vld [vmem:[%s4568_s2 + $0x198] sm:$0xff]  }
 0x12e   :  { %v1497_v30 = vmax.f32 %v4073_v54, %v1385_v13  ;;  %v1393_v34 = vmul.f32 0.2, %v1001_v16  ;;  %2274 = vmatmul.mubr.bf16.gmra.mrb[60].mxu1 %v1586_v59  ;;  %3036 = vmatpush3.bf16.msra.mxu0 %v3212_v19  ;;  %v1499_v7 = vmax.f32 %v4085_v0, %v1387_v22  ;;  %v1395_v45 = vmul.f32 0.2, %v1104_v24  ;;  %v4134_v54 = vld [vmem:[%s4569_s3 + $0x198] sm:$0xff]  ;;  %v3223_v22 = vld [vmem:[%s4568_s2 + $0x168] sm:$0xff]  }
 0x12f   :  { %v1504_v14 = vmax.f32 %v999_v1, %v1392_v23  ;;  %3094 = vmatpush3.bf16.msra.mxu1 %v3214_v9  ;;  %3037 = vmatprep.subr.bf16.mxu0 %v3215_v10  ;;  %v1506_v47 = vmax.f32 %v1102_v15, %v1394_v56  ;;  %v3220_v10 = vld [vmem:[%s4568_s2 + $0x120] sm:$0xff]   ;;  %v3225_v56 = vld [vmem:[%s4568_s2 + $0x1e8] sm:$0xff]  }
 0x130   :  { %v1505_v44 = vmax.f32 %v1001_v16, %v1393_v34  ;;  %v1004_v50 = vpop.f32.mrb[12].mxu0  ;;  %3095 = vmatprep.subr.bf16.mxu1 %v3217_v18  ;;  %v1507_v58 = vmax.f32 %v1104_v24, %v1395_v45  ;;  %v1107_v59 = vpop.f32.mrb[12].mxu1 }
 0x131   :  { %v1005_v5 = vadd.f32 %v1004_v50, %v4107_v28  ;;  %v1006_v19 = vpop.f32.mrb[13].mxu0  ;;  %v1592_v60 = vpack.c.bf16 %v1504_v14, %v1496_v21  ;;  %v1108_v0 = vadd.f32 %v1107_v59, %v4123_v46  ;;  %v1109_v2 = vpop.f32.mrb[13].mxu1  ;;  %v1594_v9 = vpack.c.bf16 %v1506_v47, %v1498_v29  ;;  %v3222_v21 = vld [vmem:[%s4568_s2 + $0x1a0] sm:$0xff]  }
 0x132   :  { %v1007_v1 = vadd.f32 %v1006_v19, %v4114_v35  ;;  %v1008_v6 = vpop.f32.mrb[14].mxu0  ;;  %v1593_v8 = vpack.c.bf16 %v1505_v44, %v1497_v30  ;;  %3038 = vmatpush3.bf16.msra.mxu0 %v3216_v38  ;;  %v1110_v13 = vadd.f32 %v1109_v2, %v4134_v54  ;;  %v1111_v16 = vpop.f32.mrb[14].mxu1  ;;  %v1595_v18 = vpack.c.bf16 %v1507_v58, %v1499_v7  ;;  %v3229_v19 = vld [vmem:[%s4568_s2 + $0x1f0] sm:$0xff]  }
 0x133   :  { %v1400_v12 = vmul.f32 0.2, %v1005_v5  ;;  %v1009_v15 = vadd.f32 %v1008_v6, %v3898_v26  ;;  %v1010_v17 = vpop.f32.mrb[15].mxu0  ;;  %3096 = vmatpush3.bf16.msra.mxu1 %v3218_v25  ;;  %3039 = vmatprep.subr.bf16.mxu0 %v3219_v32  ;;  %v1402_v23 = vmul.f32 0.2, %v1108_v0  ;;  %v1112_v29 = vadd.f32 %v1111_v16, %v3903_v41  ;;  %v1113_v26 = vpop.f32.mrb[15].mxu1 }
 0x134   :  { %v1401_v24 = vmul.f32 0.2, %v1007_v1  ;;  %v1011_v30 = vadd.f32 %v1010_v17, %v3908_v49  ;;  %2192 = vmatprep.mubr.bf16.mxu0 %v1593_v8  ;;  %3097 = vmatprep.subr.bf16.mxu1 %v3221_v57  ;;  %v1403_v38 = vmul.f32 0.2, %v1110_v13  ;;  %v1114_v14 = vadd.f32 %v1113_v26, %v3913_v61  ;;  %v3224_v49 = vld [vmem:[%s4568_s2 + $0x128] sm:$0xff]   ;;  %v3227_v57 = vld [vmem:[%s4568_s2 + $0x170] sm:$0xff]  }
 0x135   :  { %v1512_v34 = vmax.f32 %v1005_v5, %v1400_v12  ;;  %v1408_v7 = vmul.f32 0.2, %v1009_v15  ;;  %2281 = vmatprep.mubr.bf16.mxu1 %v1595_v18  ;;  %2193 = vmatmul.mubr.bf16.gmra.mrb[64].mxu0 %v1592_v60  ;;  %v1514_v45 = vmax.f32 %v1108_v0, %v1402_v23  ;;  %v1410_v32 = vmul.f32 0.2, %v1112_v29  ;;  %v3226_v61 = vld [vmem:[%s4568_s2 + $0x1a8] sm:$0xff]   ;;  %v3228_v16 = vld [vmem:[%s4568_s2 + $0x130] sm:$0xff]  }
 0x136   :  { %v1513_v25 = vmax.f32 %v1007_v1, %v1401_v24  ;;  %v1409_v41 = vmul.f32 0.2, %v1011_v30  ;;  %2282 = vmatmul.mubr.bf16.gmra.mrb[64].mxu1 %v1594_v9  ;;  %3040 = vmatpush3.bf16.msra.mxu0 %v3220_v10  ;;  %v1515_v47 = vmax.f32 %v1110_v13, %v1403_v38  ;;  %v1411_v50 = vmul.f32 0.2, %v1114_v14  ;;  %v3233_v26 = vld [vmem:[%s4568_s2 + $0x1f8] sm:$0xff]  }
 0x137   :  { %v1520_v44 = vmax.f32 %v1009_v15, %v1408_v7  ;;  %3098 = vmatpush3.bf16.msra.mxu1 %v3222_v21  ;;  %3041 = vmatprep.subr.bf16.mxu0 %v3223_v22  ;;  %v1522_v58 = vmax.f32 %v1112_v29, %v1410_v32 }
 0x138   :  { %v1521_v5 = vmax.f32 %v1011_v30, %v1409_v41  ;;  %v1014_v59 = vpop.f32.mrb[16].mxu0  ;;  %3099 = vmatprep.subr.bf16.mxu1 %v3225_v56  ;;  %v1523_v60 = vmax.f32 %v1114_v14, %v1411_v50  ;;  %v1117_v1 = vpop.f32.mrb[16].mxu1 }
 0x139   :  { %v1015_v0 = vadd.f32 %v1014_v59, %v3918_v62  ;;  %v1016_v2 = vpop.f32.mrb[17].mxu0  ;;  %v1600_v6 = vpack.c.bf16 %v1520_v44, %v1512_v34  ;;  %v1118_v8 = vadd.f32 %v1117_v1, %v3924_v3  ;;  %v1119_v10 = vpop.f32.mrb[17].mxu1  ;;  %v1602_v15 = vpack.c.bf16 %v1522_v58, %v1514_v45  ;;  %v3230_v3 = vld [vmem:[%s4568_s2 + $0x1b0] sm:$0xff]  }
 0x13a   :  { %v1017_v9 = vadd.f32 %v1016_v2, %v3929_v4  ;;  %v1018_v12 = vpop.f32.mrb[18].mxu0  ;;  %v1601_v13 = vpack.c.bf16 %v1521_v5, %v1513_v25  ;;  %3042 = vmatpush3.bf16.msra.mxu0 %v3224_v49  ;;  %v1120_v18 = vadd.f32 %v1119_v10, %v3936_v11  ;;  %v1121_v21 = vpop.f32.mrb[18].mxu1  ;;  %v1603_v23 = vpack.c.bf16 %v1523_v60, %v1515_v47  ;;  %v3231_v4 = vld [vmem:[%s4568_s2 + $0x178] sm:$0xff]  }
 0x13b   :  { %v1416_v17 = vmul.f32 0.2, %v1015_v0  ;;  %v1019_v62 = vadd.f32 %v1018_v12, %v3946_v31  ;;  %v1020_v22 = vpop.f32.mrb[19].mxu0  ;;  %3100 = vmatpush3.bf16.msra.mxu1 %v3226_v61  ;;  %3043 = vmatprep.subr.bf16.mxu0 %v3227_v57  ;;  %v1418_v24 = vmul.f32 0.2, %v1118_v8  ;;  %v1122_v30 = vadd.f32 %v1121_v21, %v3951_v36  ;;  %v1123_v31 = vpop.f32.mrb[19].mxu1 }
 0x13c   :  { %v1417_v29 = vmul.f32 0.2, %v1017_v9  ;;  %v1021_v11 = vadd.f32 %v1020_v22, %v3956_v37  ;;  %2200 = vmatprep.mubr.bf16.mxu0 %v1601_v13  ;;  %3101 = vmatprep.subr.bf16.mxu1 %v3229_v19  ;;  %v1419_v34 = vmul.f32 0.2, %v1120_v18  ;;  %v1124_v7 = vadd.f32 %v1123_v31, %v3961_v40  ;;  %v3232_v37 = vld [vmem:[%s4568_s2 + $0x138] sm:$0xff]  }
 0x13d   :  { %v1528_v56 = vmax.f32 %v1015_v0, %v1416_v17  ;;  %v1424_v38 = vmul.f32 0.2, %v1019_v62  ;;  %2289 = vmatprep.mubr.bf16.mxu1 %v1603_v23  ;;  %2201 = vmatmul.mubr.bf16.gmra.mrb[68].mxu0 %v1600_v6  ;;  %v1530_v14 = vmax.f32 %v1118_v8, %v1418_v24  ;;  %v1426_v25 = vmul.f32 0.2, %v1122_v30  ;;  %v3234_v40 = vld [vmem:[%s4568_s2 + $0x1b8] sm:$0xff]  }
 0x13e   :  { %v1529_v45 = vmax.f32 %v1017_v9, %v1417_v29  ;;  %v1425_v36 = vmul.f32 0.2, %v1021_v11  ;;  %2290 = vmatmul.mubr.bf16.gmra.mrb[68].mxu1 %v1602_v15  ;;  %3044 = vmatpush3.bf16.msra.mxu0 %v3228_v16  ;;  %v1531_v32 = vmax.f32 %v1120_v18, %v1419_v34  ;;  %v1427_v49 = vmul.f32 0.2, %v1124_v7 }
 0x13f   :  { %v1536_v41 = vmax.f32 %v1019_v62, %v1424_v38  ;;  %3102 = vmatpush3.bf16.msra.mxu1 %v3230_v3  ;;  %3045 = vmatprep.subr.bf16.mxu0 %v3231_v4  ;;  %v1538_v47 = vmax.f32 %v1122_v30, %v1426_v25 }
 0x140   :  { %v1537_v44 = vmax.f32 %v1021_v11, %v1425_v36  ;;  %v1024_v50 = vpop.f32.mrb[20].mxu0  ;;  %3103 = vmatprep.subr.bf16.mxu1 %v3233_v26  ;;  %v1539_v61 = vmax.f32 %v1124_v7, %v1427_v49  ;;  %v1127_v58 = vpop.f32.mrb[20].mxu1 }
 0x141   :  { %v1025_v57 = vadd.f32 %v1024_v50, %v3966_v42  ;;  %v1026_v5 = vpop.f32.mrb[21].mxu0  ;;  %v1608_v59 = vpack.c.bf16 %v1536_v41, %v1528_v56  ;;  %v1128_v19 = vadd.f32 %v1127_v58, %v3974_v48  ;;  %v1129_v0 = vpop.f32.mrb[21].mxu1  ;;  %v1610_v6 = vpack.c.bf16 %v1538_v47, %v1530_v14 }
 0x142   :  { %v1027_v60 = vadd.f32 %v1026_v5, %v3979_v51  ;;  %v1028_v1 = vpop.f32.mrb[22].mxu0  ;;  %v1609_v2 = vpack.c.bf16 %v1537_v44, %v1529_v45  ;;  %3046 = vmatpush3.bf16.msra.mxu0 %v3232_v37  ;;  %v1130_v9 = vadd.f32 %v1129_v0, %v3990_v55  ;;  %v1131_v12 = vpop.f32.mrb[22].mxu1  ;;  %v1611_v42 = vpack.c.bf16 %v1539_v61, %v1531_v32 }
 0x143   :  { %v1432_v8 = vmul.f32 0.2, %v1025_v57  ;;  %v1029_v10 = vadd.f32 %v1028_v1, %v4019_v20  ;;  %v1030_v13 = vpop.f32.mrb[23].mxu0  ;;  %3104 = vmatpush3.bf16.msra.mxu1 %v3234_v40  ;;  %v1434_v15 = vmul.f32 0.2, %v1128_v19  ;;  %v1132_v48 = vadd.f32 %v1131_v12, %v4035_v33  ;;  %v1133_v17 = vpop.f32.mrb[23].mxu1 }
 0x144   :  { %v1433_v16 = vmul.f32 0.2, %v1027_v60  ;;  %v1031_v51 = vadd.f32 %v1030_v13, %v4026_v27  ;;  %2208 = vmatprep.mubr.bf16.mxu0 %v1609_v2  ;;  %v1435_v62 = vmul.f32 0.2, %v1130_v9  ;;  %v1134_v22 = vadd.f32 %v1133_v17, %v4046_v39  ;;  %2297 = vmatprep.mubr.bf16.mxu1 %v1611_v42  ;;  %v4226_v12 = vld [vmem:[%s4569_s3 + $0x28] sm:$0xff]  ;;  %v4231_v42 = vld [vmem:[%s4569_s3 + $0x38] sm:$0xff] }
 0x145   :  { %v1544_v18 = vmax.f32 %v1025_v57, %v1432_v8  ;;  %v1440_v21 = vmul.f32 0.2, %v1029_v10  ;;  %2209 = vmatmul.mubr.bf16.gmra.mrb[72].mxu0 %v1608_v59  ;;  %v1546_v55 = vmax.f32 %v1128_v19, %v1434_v15  ;;  %v1442_v23 = vmul.f32 0.2, %v1132_v48  ;;  %v4236_v15 = vld [vmem:[%s4569_s3 + $0x60] sm:$0xff]  ;;  %v4242_v17 = vld [vmem:[%s4569_s3 + $0x70] sm:$0xff] }
 0x146   :  { %v1545_v20 = vmax.f32 %v1027_v60, %v1433_v16  ;;  %v1441_v3 = vmul.f32 0.2, %v1031_v51  ;;  %2298 = vmatmul.mubr.bf16.gmra.mrb[72].mxu1 %v1610_v6  ;;  %v1547_v4 = vmax.f32 %v1130_v9, %v1435_v62  ;;  %v1443_v29 = vmul.f32 0.2, %v1134_v22 }
 0x147   :  { %v1552_v24 = vmax.f32 %v1029_v10, %v1440_v21  ;;  %v1554_v33 = vmax.f32 %v1132_v48, %v1442_v23  ;;  %v4221_v10 = vld [vmem:[%s4569_s3 + $0x30] sm:$0xff] }
 0x148   :  { %v1553_v30 = vmax.f32 %v1031_v51, %v1441_v3  ;;  %v1034_v27 = vpop.f32.mrb[24].mxu0  ;;  %v1555_v11 = vmax.f32 %v1134_v22, %v1443_v29  ;;  %v1137_v26 = vpop.f32.mrb[24].mxu1 }
 0x149   :  { %v1035_v31 = vadd.f32 %v1034_v27, %v4051_v43  ;;  %v1036_v56 = vpop.f32.mrb[25].mxu0  ;;  %v1616_v34 = vpack.c.bf16 %v1552_v24, %v1544_v18  ;;  %v1138_v39 = vadd.f32 %v1137_v26, %v4062_v52  ;;  %v1139_v7 = vpop.f32.mrb[25].mxu1  ;;  %v1618_v25 = vpack.c.bf16 %v1554_v33, %v1546_v55  ;;  %v4247_v18 = vld [vmem:[%s4569_s3 + $0x68] sm:$0xff] }
 0x14a   :  { %v1037_v38 = vadd.f32 %v1036_v56, %v4067_v53  ;;  %v1038_v14 = vpop.f32.mrb[26].mxu0  ;;  %v1617_v45 = vpack.c.bf16 %v1553_v30, %v1545_v20  ;;  %v1140_v37 = vadd.f32 %v1139_v7, %v4078_v63  ;;  %v1141_v41 = vpop.f32.mrb[26].mxu1  ;;  %v1619_v40 = vpack.c.bf16 %v1555_v11, %v1547_v4  ;;  %v4254_v20 = vld [vmem:[%s4569_s3 + $0x78] sm:$0xff]  ;;  %v4264_v7 = vld [vmem:[%s4569_s3 + $0xa0] sm:$0xff] }
 0x14b   :  { %v1448_v36 = vmul.f32 0.2, %v1035_v31  ;;  %v1039_v32 = vadd.f32 %v1038_v14, %v4107_v28  ;;  %v1040_v49 = vpop.f32.mrb[27].mxu0  ;;  %v1450_v43 = vmul.f32 0.2, %v1138_v39  ;;  %v1142_v44 = vadd.f32 %v1141_v41, %v4123_v46  ;;  %v1143_v50 = vpop.f32.mrb[27].mxu1 }
 0x14c   :  { %v1449_v47 = vmul.f32 0.2, %v1037_v38  ;;  %v1041_v52 = vadd.f32 %v1040_v49, %v4114_v35  ;;  %2216 = vmatprep.mubr.bf16.mxu0 %v1617_v45  ;;  %v1451_v61 = vmul.f32 0.2, %v1140_v37  ;;  %v1144_v58 = vadd.f32 %v1143_v50, %v4134_v54  ;;  %2305 = vmatprep.mubr.bf16.mxu1 %v1619_v40  ;;  %v4216_v54 = vld [vmem:[%s4569_s3 + $0x20] sm:$0xff] }
 0x14d   :  { %v1560_v53 = vmax.f32 %v1035_v31, %v1448_v36  ;;  %v1456_v57 = vmul.f32 0.2, %v1039_v32  ;;  %2217 = vmatmul.mubr.bf16.gmra.mrb[76].mxu0 %v1616_v34  ;;  %v1562_v63 = vmax.f32 %v1138_v39, %v1450_v43  ;;  %v1458_v5 = vmul.f32 0.2, %v1142_v44  ;;  %v4269_v36 = vld [vmem:[%s4569_s3 + $0xb0] sm:$0xff] }
 0x14e   :  { %v1561_v28 = vmax.f32 %v1037_v38, %v1449_v47  ;;  %v1457_v59 = vmul.f32 0.2, %v1041_v52  ;;  %2306 = vmatmul.mubr.bf16.gmra.mrb[76].mxu1 %v1618_v25  ;;  %v1563_v19 = vmax.f32 %v1140_v37, %v1451_v61  ;;  %v1459_v0 = vmul.f32 0.2, %v1144_v58  ;;  %v4274_v37 = vld [vmem:[%s4569_s3 + $0xa8] sm:$0xff]  ;;  %v4279_v47 = vld [vmem:[%s4569_s3 + $0xb8] sm:$0xff] }
 0x14f   :  { %v1568_v60 = vmax.f32 %v1039_v32, %v1456_v57  ;;  %v1570_v46 = vmax.f32 %v1142_v44, %v1458_v5  ;;  %v4284_v44 = vld [vmem:[%s4569_s3 + $0xe0] sm:$0xff] }
 0x150   :  { %v1569_v1 = vmax.f32 %v1041_v52, %v1457_v59  ;;  %v1571_v35 = vmax.f32 %v1144_v58, %v1459_v0 }
 0x151   :  { %v1624_v2 = vpack.c.bf16 %v1568_v60, %v1560_v53  ;;  %v1626_v8 = vpack.c.bf16 %v1570_v46, %v1562_v63  ;;  %v4290_v63 = vld [vmem:[%s4569_s3 + $0xf0] sm:$0xff]  ;;  %v4302_v46 = vld [vmem:[%s4569_s3 + $0xf8] sm:$0xff] }
 0x152   :  { %v1625_v6 = vpack.c.bf16 %v1569_v1, %v1561_v28  ;;  %v1627_v9 = vpack.c.bf16 %v1571_v35, %v1563_v19  ;;  %v4295_v28 = vld [vmem:[%s4569_s3 + $0xe8] sm:$0xff] }
 0x154   :  { %2224 = vmatprep.mubr.bf16.mxu0 %v1625_v6  ;;  %2313 = vmatprep.mubr.bf16.mxu1 %v1627_v9 }
 0x155   :  { %2225 = vmatmul.mubr.bf16.gmra.mrb[80].mxu0 %v1624_v2 }
 0x156   :  { %2314 = vmatmul.mubr.bf16.gmra.mrb[80].mxu1 %v1626_v8 }
 0x158   :  { %v1180_v13 = vpop.f32.mrb[28].mxu0  ;;  %v1283_v48 = vpop.f32.mrb[28].mxu1 }
 0x159   :  { %v1181_v16 = vadd.f32 %v1180_v13, %v4216_v54  ;;  %v1182_v51 = vpop.f32.mrb[29].mxu0  ;;  %v1284_v62 = vadd.f32 %v1283_v48, %v4221_v10  ;;  %v1285_v22 = vpop.f32.mrb[29].mxu1 }
 0x15a   :  { %v1183_v21 = vadd.f32 %v1182_v51, %v4226_v12  ;;  %v1184_v55 = vpop.f32.mrb[30].mxu0  ;;  %v1286_v3 = vadd.f32 %v1285_v22, %v4231_v42  ;;  %v1287_v24 = vpop.f32.mrb[30].mxu1 }
 0x15b   :  { %v1356_v23 = vmul.f32 0.2, %v1181_v16  ;;  %v1185_v4 = vadd.f32 %v1184_v55, %v4236_v15  ;;  %v1186_v29 = vpop.f32.mrb[31].mxu0  ;;  %v1358_v33 = vmul.f32 0.2, %v1284_v62  ;;  %v1288_v27 = vadd.f32 %v1287_v24, %v4242_v17  ;;  %v1289_v31 = vpop.f32.mrb[31].mxu1 }
 0x15c   :  { %v1357_v30 = vmul.f32 0.2, %v1183_v21  ;;  %v1187_v11 = vadd.f32 %v1186_v29, %v4247_v18  ;;  %v1359_v26 = vmul.f32 0.2, %v1286_v3  ;;  %v1290_v34 = vadd.f32 %v1289_v31, %v4254_v20  ;;  %v4312_v24 = vld [vmem:[%s4569_s3 + $0x120] sm:$0xff] }
 0x15d   :  { %v1364_v56 = vmul.f32 0.2, %v1185_v4  ;;  %v1366_v39 = vmul.f32 0.2, %v1288_v27  ;;  %v1468_v14 = vmax.f32 %v1181_v16, %v1356_v23  ;;  %v1470_v32 = vmax.f32 %v1284_v62, %v1358_v33 }
 0x15e   :  { %v1365_v38 = vmul.f32 0.2, %v1187_v11  ;;  %v1367_v25 = vmul.f32 0.2, %v1290_v34  ;;  %v1469_v41 = vmax.f32 %v1183_v21, %v1357_v30  ;;  %v1471_v52 = vmax.f32 %v1286_v3, %v1359_v26 }
 0x15f   :  { %v1476_v45 = vmax.f32 %v1185_v4, %v1364_v56  ;;  %v1478_v49 = vmax.f32 %v1288_v27, %v1366_v39  ;;  %v4317_v27 = vld [vmem:[%s4569_s3 + $0x130] sm:$0xff] }
 0x160   :  { %v1477_v40 = vmax.f32 %v1187_v11, %v1365_v38  ;;  %v1190_v43 = vpop.f32.mrb[32].mxu0  ;;  %v1479_v53 = vmax.f32 %v1290_v34, %v1367_v25  ;;  %v1293_v57 = vpop.f32.mrb[32].mxu1  ;;  %v4322_v11 = vld [vmem:[%s4569_s3 + $0x128] sm:$0xff]  ;;  %v4327_v38 = vld [vmem:[%s4569_s3 + $0x138] sm:$0xff] }
 0x161   :  { %v1580_v50 = vpack.c.bf16 %v1476_v45, %v1468_v14  ;;  %v1191_v61 = vadd.f32 %v1190_v43, %v4264_v7  ;;  %v1192_v58 = vpop.f32.mrb[33].mxu0  ;;  %v1582_v5 = vpack.c.bf16 %v1478_v49, %v1470_v32  ;;  %v1294_v59 = vadd.f32 %v1293_v57, %v4269_v36  ;;  %v1295_v60 = vpop.f32.mrb[33].mxu1  ;;  %v4332_v14 = vld [vmem:[%s4569_s3 + $0x160] sm:$0xff]  ;;  %v4343_v43 = vld [vmem:[%s4569_s3 + $0x168] sm:$0xff] }
 0x162   :  { %v1193_v19 = vadd.f32 %v1192_v58, %v4274_v37  ;;  %v1194_v0 = vpop.f32.mrb[34].mxu0  ;;  %v1581_v1 = vpack.c.bf16 %v1477_v40, %v1469_v41  ;;  %v1296_v2 = vadd.f32 %v1295_v60, %v4279_v47  ;;  %v1297_v8 = vpop.f32.mrb[34].mxu1  ;;  %v1583_v13 = vpack.c.bf16 %v1479_v53, %v1471_v52  ;;  %v4338_v40 = vld [vmem:[%s4569_s3 + $0x170] sm:$0xff]  ;;  %v4350_v58 = vld [vmem:[%s4569_s3 + $0x178] sm:$0xff] }
 0x163   :  { %v1372_v35 = vmul.f32 0.2, %v1191_v61  ;;  %v1195_v6 = vadd.f32 %v1194_v0, %v4284_v44  ;;  %v1196_v9 = vpop.f32.mrb[35].mxu0  ;;  %v1374_v16 = vmul.f32 0.2, %v1294_v59  ;;  %v1298_v51 = vadd.f32 %v1297_v8, %v4290_v63  ;;  %v1299_v21 = vpop.f32.mrb[35].mxu1 }
 0x164   :  { %v1373_v48 = vmul.f32 0.2, %v1193_v19  ;;  %v1197_v62 = vadd.f32 %v1196_v9, %v4295_v28  ;;  %2354 = vmatprep.mubr.bf16.mxu0 %v1581_v1  ;;  %v1375_v22 = vmul.f32 0.2, %v1296_v2  ;;  %v1300_v23 = vadd.f32 %v1299_v21, %v4302_v46  ;;  %2443 = vmatprep.mubr.bf16.mxu1 %v1583_v13 }
 0x165   :  { %v1380_v55 = vmul.f32 0.2, %v1195_v6  ;;  %2355 = vmatmul.mubr.bf16.vlgmr.msra.gmra.mrb[84].mxu0 %v1580_v50  ;;  %v1382_v3 = vmul.f32 0.2, %v1298_v51  ;;  %2444 = vmatmul.mubr.bf16.vlgmr.msra.gmra.mrb[84].mxu1 %v1582_v5  ;;  %v1484_v29 = vmax.f32 %v1191_v61, %v1372_v35  ;;  %v1486_v31 = vmax.f32 %v1294_v59, %v1374_v16 }
 0x166   :  { %v1381_v4 = vmul.f32 0.2, %v1197_v62  ;;  %v1383_v30 = vmul.f32 0.2, %v1300_v23  ;;  %v1485_v26 = vmax.f32 %v1193_v19, %v1373_v48  ;;  %v1487_v45 = vmax.f32 %v1296_v2, %v1375_v22 }
 0x167   :  { %v1492_v33 = vmax.f32 %v1195_v6, %v1380_v55  ;;  %v1494_v56 = vmax.f32 %v1298_v51, %v1382_v3  ;;  %v4360_v55 = vld [vmem:[%s4569_s3 + $0x1a0] sm:$0xff] }
 0x168   :  { %v1493_v34 = vmax.f32 %v1197_v62, %v1381_v4  ;;  %v1200_v39 = vpop.f32.mrb[36].mxu0  ;;  %v1495_v25 = vmax.f32 %v1300_v23, %v1383_v30  ;;  %v1303_v41 = vpop.f32.mrb[36].mxu1 }
 0x169   :  { %v1201_v32 = vadd.f32 %v1200_v39, %v4312_v24  ;;  %v1202_v49 = vpop.f32.mrb[37].mxu0  ;;  %v1588_v52 = vpack.c.bf16 %v1492_v33, %v1484_v29  ;;  %v1304_v50 = vadd.f32 %v1303_v41, %v4317_v27  ;;  %v1305_v61 = vpop.f32.mrb[37].mxu1  ;;  %v1590_v59 = vpack.c.bf16 %v1494_v56, %v1486_v31  ;;  %v4365_v29 = vld [vmem:[%s4569_s3 + $0x1b0] sm:$0xff]  ;;  %v4370_v33 = vld [vmem:[%s4569_s3 + $0x1a8] sm:$0xff]  ;;  %v4375_v39 = vld [vmem:[%s4569_s3 + $0x1b8] sm:$0xff] }
 0x16a   :  { %v1203_v53 = vadd.f32 %v1202_v49, %v4322_v11  ;;  %v1204_v57 = vpop.f32.mrb[38].mxu0  ;;  %v1589_v5 = vpack.c.bf16 %v1493_v34, %v1485_v26  ;;  %v1306_v60 = vadd.f32 %v1305_v61, %v4327_v38  ;;  %v1307_v1 = vpop.f32.mrb[38].mxu1  ;;  %v1591_v2 = vpack.c.bf16 %v1495_v25, %v1487_v45 }
 0x16b   :  { %v1388_v19 = vmul.f32 0.2, %v1201_v32  ;;  %v1205_v0 = vadd.f32 %v1204_v57, %v4332_v14  ;;  %v1206_v35 = vpop.f32.mrb[39].mxu0  ;;  %v1390_v6 = vmul.f32 0.2, %v1304_v50  ;;  %v1308_v9 = vadd.f32 %v1307_v1, %v4338_v40  ;;  %v1309_v16 = vpop.f32.mrb[39].mxu1 }
 0x16c   :  { %v1389_v8 = vmul.f32 0.2, %v1203_v53  ;;  %v1207_v13 = vadd.f32 %v1206_v35, %v4343_v43  ;;  %2362 = vmatprep.mubr.bf16.mxu0 %v1589_v5  ;;  %v1391_v48 = vmul.f32 0.2, %v1306_v60  ;;  %v1310_v62 = vadd.f32 %v1309_v16, %v4350_v58  ;;  %2451 = vmatprep.mubr.bf16.mxu1 %v1591_v2 }
 0x16d   :  { %v1396_v51 = vmul.f32 0.2, %v1205_v0  ;;  %2363 = vmatmul.mubr.bf16.gmra.mrb[88].mxu0 %v1588_v52  ;;  %v1398_v21 = vmul.f32 0.2, %v1308_v9  ;;  %2452 = vmatmul.mubr.bf16.gmra.mrb[88].mxu1 %v1590_v59  ;;  %v1500_v23 = vmax.f32 %v1201_v32, %v1388_v19  ;;  %v1502_v30 = vmax.f32 %v1304_v50, %v1390_v6 }
 0x16e   :  { %v1397_v22 = vmul.f32 0.2, %v1207_v13  ;;  %v1399_v4 = vmul.f32 0.2, %v1310_v62  ;;  %v1501_v31 = vmax.f32 %v1203_v53, %v1389_v8  ;;  %v1503_v45 = vmax.f32 %v1306_v60, %v1391_v48 }
 0x16f   :  { %v1508_v3 = vmax.f32 %v1205_v0, %v1396_v51  ;;  %v1510_v26 = vmax.f32 %v1308_v9, %v1398_v21 }
 0x170   :  { %v1509_v56 = vmax.f32 %v1207_v13, %v1397_v22  ;;  %v1210_v34 = vpop.f32.mrb[40].mxu0  ;;  %v1511_v25 = vmax.f32 %v1310_v62, %v1399_v4  ;;  %v1313_v41 = vpop.f32.mrb[40].mxu1 }
 0x171   :  { %v1211_v32 = vadd.f32 %v1210_v34, %v4360_v55  ;;  %v1212_v49 = vpop.f32.mrb[41].mxu0  ;;  %v1596_v52 = vpack.c.bf16 %v1508_v3, %v1500_v23  ;;  %v1314_v61 = vadd.f32 %v1313_v41, %v4365_v29  ;;  %v1315_v53 = vpop.f32.mrb[41].mxu1  ;;  %v1598_v59 = vpack.c.bf16 %v1510_v26, %v1502_v30 }
 0x172   :  { %v1213_v50 = vadd.f32 %v1212_v49, %v4370_v33  ;;  %v1214_v57 = vpop.f32.mrb[42].mxu0  ;;  %v1597_v5 = vpack.c.bf16 %v1509_v56, %v1501_v31  ;;  %v1316_v0 = vadd.f32 %v1315_v53, %v4375_v39  ;;  %v1317_v60 = vpop.f32.mrb[42].mxu1  ;;  %v1599_v2 = vpack.c.bf16 %v1511_v25, %v1503_v45 }
 0x173   :  { %v1404_v19 = vmul.f32 0.2, %v1211_v32  ;;  %v1215_v1 = vadd.f32 %v1214_v57, %v4216_v54  ;;  %v1216_v35 = vpop.f32.mrb[43].mxu0  ;;  %v1406_v6 = vmul.f32 0.2, %v1314_v61  ;;  %v1318_v9 = vadd.f32 %v1317_v60, %v4221_v10  ;;  %v1319_v16 = vpop.f32.mrb[43].mxu1 }
 0x174   :  { %v1405_v8 = vmul.f32 0.2, %v1213_v50  ;;  %v1217_v13 = vadd.f32 %v1216_v35, %v4226_v12  ;;  %2370 = vmatprep.mubr.bf16.mxu0 %v1597_v5  ;;  %v1407_v48 = vmul.f32 0.2, %v1316_v0  ;;  %v1320_v62 = vadd.f32 %v1319_v16, %v4231_v42  ;;  %2459 = vmatprep.mubr.bf16.mxu1 %v1599_v2 }
 0x175   :  { %v1412_v51 = vmul.f32 0.2, %v1215_v1  ;;  %2371 = vmatmul.mubr.bf16.gmra.mrb[92].mxu0 %v1596_v52  ;;  %v1414_v21 = vmul.f32 0.2, %v1318_v9  ;;  %2460 = vmatmul.mubr.bf16.gmra.mrb[92].mxu1 %v1598_v59  ;;  %v1516_v54 = vmax.f32 %v1211_v32, %v1404_v19  ;;  %v1518_v4 = vmax.f32 %v1314_v61, %v1406_v6 }
 0x176   :  { %v1413_v22 = vmul.f32 0.2, %v1217_v13  ;;  %v1415_v3 = vmul.f32 0.2, %v1320_v62  ;;  %v1517_v30 = vmax.f32 %v1213_v50, %v1405_v8  ;;  %v1519_v12 = vmax.f32 %v1316_v0, %v1407_v48 }
 0x177   :  { %v1524_v23 = vmax.f32 %v1215_v1, %v1412_v51  ;;  %v1526_v31 = vmax.f32 %v1318_v9, %v1414_v21 }
 0x178   :  { %v1525_v10 = vmax.f32 %v1217_v13, %v1413_v22  ;;  %v1220_v26 = vpop.f32.mrb[44].mxu0  ;;  %v1527_v56 = vmax.f32 %v1320_v62, %v1415_v3  ;;  %v1323_v45 = vpop.f32.mrb[44].mxu1 }
 0x179   :  { %v1221_v34 = vadd.f32 %v1220_v26, %v4236_v15  ;;  %v1222_v25 = vpop.f32.mrb[45].mxu0  ;;  %v1604_v42 = vpack.c.bf16 %v1524_v23, %v1516_v54  ;;  %v1324_v41 = vadd.f32 %v1323_v45, %v4242_v17  ;;  %v1325_v52 = vpop.f32.mrb[45].mxu1  ;;  %v1606_v57 = vpack.c.bf16 %v1526_v31, %v1518_v4 }
 0x17a   :  { %v1223_v49 = vadd.f32 %v1222_v25, %v4247_v18  ;;  %v1224_v32 = vpop.f32.mrb[46].mxu0  ;;  %v1605_v53 = vpack.c.bf16 %v1525_v10, %v1517_v30  ;;  %v1326_v50 = vadd.f32 %v1325_v52, %v4254_v20  ;;  %v1327_v59 = vpop.f32.mrb[46].mxu1  ;;  %v1607_v0 = vpack.c.bf16 %v1527_v56, %v1519_v12 }
 0x17b   :  { %v1420_v61 = vmul.f32 0.2, %v1221_v34  ;;  %v1225_v5 = vadd.f32 %v1224_v32, %v4264_v7  ;;  %v1226_v19 = vpop.f32.mrb[47].mxu0  ;;  %v1422_v15 = vmul.f32 0.2, %v1324_v41  ;;  %v1328_v60 = vadd.f32 %v1327_v59, %v4269_v36  ;;  %v1329_v35 = vpop.f32.mrb[47].mxu1 }
 0x17c   :  { %v1421_v1 = vmul.f32 0.2, %v1223_v49  ;;  %v1227_v17 = vadd.f32 %v1226_v19, %v4274_v37  ;;  %2378 = vmatprep.mubr.bf16.mxu0 %v1605_v53  ;;  %v1423_v18 = vmul.f32 0.2, %v1326_v50  ;;  %v1330_v6 = vadd.f32 %v1329_v35, %v4279_v47  ;;  %2467 = vmatprep.mubr.bf16.mxu1 %v1607_v0 }
 0x17d   :  { %v1428_v2 = vmul.f32 0.2, %v1225_v5  ;;  %2379 = vmatmul.mubr.bf16.gmra.mrb[96].mxu0 %v1604_v42  ;;  %v1430_v20 = vmul.f32 0.2, %v1328_v60  ;;  %2468 = vmatmul.mubr.bf16.gmra.mrb[96].mxu1 %v1606_v57  ;;  %v1532_v7 = vmax.f32 %v1221_v34, %v1420_v61  ;;  %v1534_v16 = vmax.f32 %v1324_v41, %v1422_v15 }
 0x17e   :  { %v1429_v8 = vmul.f32 0.2, %v1227_v17  ;;  %v1431_v13 = vmul.f32 0.2, %v1330_v6  ;;  %v1533_v48 = vmax.f32 %v1223_v49, %v1421_v1  ;;  %v1535_v37 = vmax.f32 %v1326_v50, %v1423_v18 }
 0x17f   :  { %v1540_v9 = vmax.f32 %v1225_v5, %v1428_v2  ;;  %v1542_v51 = vmax.f32 %v1328_v60, %v1430_v20 }
 0x180   :  { %v1541_v36 = vmax.f32 %v1227_v17, %v1429_v8  ;;  %v1230_v62 = vpop.f32.mrb[48].mxu0  ;;  %v1543_v21 = vmax.f32 %v1330_v6, %v1431_v13  ;;  %v1333_v54 = vpop.f32.mrb[48].mxu1 }
 0x181   :  { %v1231_v22 = vadd.f32 %v1230_v62, %v4284_v44  ;;  %v1232_v23 = vpop.f32.mrb[49].mxu0  ;;  %v1612_v47 = vpack.c.bf16 %v1540_v9, %v1532_v7  ;;  %v1334_v3 = vadd.f32 %v1333_v54, %v4290_v63  ;;  %v1335_v30 = vpop.f32.mrb[49].mxu1  ;;  %v1614_v26 = vpack.c.bf16 %v1542_v51, %v1534_v16 }
 0x182   :  { %v1233_v4 = vadd.f32 %v1232_v23, %v4295_v28  ;;  %v1234_v31 = vpop.f32.mrb[50].mxu0  ;;  %v1613_v10 = vpack.c.bf16 %v1541_v36, %v1533_v48  ;;  %v1336_v56 = vadd.f32 %v1335_v30, %v4302_v46  ;;  %v1337_v45 = vpop.f32.mrb[50].mxu1  ;;  %v1615_v42 = vpack.c.bf16 %v1543_v21, %v1535_v37 }
 0x183   :  { %v1436_v12 = vmul.f32 0.2, %v1231_v22  ;;  %v1235_v34 = vadd.f32 %v1234_v31, %v4312_v24  ;;  %v1236_v25 = vpop.f32.mrb[51].mxu0  ;;  %v1438_v44 = vmul.f32 0.2, %v1334_v3  ;;  %v1338_v49 = vadd.f32 %v1337_v45, %v4317_v27  ;;  %v1339_v52 = vpop.f32.mrb[51].mxu1 }
 0x184   :  { %v1437_v41 = vmul.f32 0.2, %v1233_v4  ;;  %v1237_v63 = vadd.f32 %v1236_v25, %v4322_v11  ;;  %2386 = vmatprep.mubr.bf16.mxu0 %v1613_v10  ;;  %v1439_v28 = vmul.f32 0.2, %v1336_v56  ;;  %v1340_v53 = vadd.f32 %v1339_v52, %v4327_v38  ;;  %2475 = vmatprep.mubr.bf16.mxu1 %v1615_v42 }
 0x185   :  { %v1444_v32 = vmul.f32 0.2, %v1235_v34  ;;  %2387 = vmatmul.mubr.bf16.gmra.mrb[100].mxu0 %v1612_v47  ;;  %v1446_v46 = vmul.f32 0.2, %v1338_v49  ;;  %2476 = vmatmul.mubr.bf16.gmra.mrb[100].mxu1 %v1614_v26  ;;  %v1548_v24 = vmax.f32 %v1231_v22, %v1436_v12  ;;  %v1550_v5 = vmax.f32 %v1334_v3, %v1438_v44 }
 0x186   :  { %v1445_v57 = vmul.f32 0.2, %v1237_v63  ;;  %v1447_v50 = vmul.f32 0.2, %v1340_v53  ;;  %v1549_v59 = vmax.f32 %v1233_v4, %v1437_v41  ;;  %v1551_v11 = vmax.f32 %v1336_v56, %v1439_v28 }
 0x187   :  { %v1556_v61 = vmax.f32 %v1235_v34, %v1444_v32  ;;  %v1558_v19 = vmax.f32 %v1338_v49, %v1446_v46 }
 0x188   :  { %v1557_v27 = vmax.f32 %v1237_v63, %v1445_v57  ;;  %v1240_v0 = vpop.f32.mrb[52].mxu0  ;;  %v1559_v15 = vmax.f32 %v1340_v53, %v1447_v50  ;;  %v1343_v60 = vpop.f32.mrb[52].mxu1 }
 0x189   :  { %v1241_v1 = vadd.f32 %v1240_v0, %v4332_v14  ;;  %v1242_v17 = vpop.f32.mrb[53].mxu0  ;;  %v1620_v38 = vpack.c.bf16 %v1556_v61, %v1548_v24  ;;  %v1344_v35 = vadd.f32 %v1343_v60, %v4338_v40  ;;  %v1345_v2 = vpop.f32.mrb[53].mxu1  ;;  %v1622_v8 = vpack.c.bf16 %v1558_v19, %v1550_v5 }
 0x18a   :  { %v1243_v18 = vadd.f32 %v1242_v17, %v4343_v43  ;;  %v1244_v6 = vpop.f32.mrb[54].mxu0  ;;  %v1621_v20 = vpack.c.bf16 %v1557_v27, %v1549_v59  ;;  %v1346_v9 = vadd.f32 %v1345_v2, %v4350_v58  ;;  %v1347_v16 = vpop.f32.mrb[54].mxu1  ;;  %v1623_v51 = vpack.c.bf16 %v1559_v15, %v1551_v11 }
 0x18b   :  { %v1452_v7 = vmul.f32 0.2, %v1241_v1  ;;  %v1245_v13 = vadd.f32 %v1244_v6, %v4360_v55  ;;  %v1246_v48 = vpop.f32.mrb[55].mxu0  ;;  %v1454_v14 = vmul.f32 0.2, %v1344_v35  ;;  %v1348_v62 = vadd.f32 %v1347_v16, %v4365_v29  ;;  %v1349_v37 = vpop.f32.mrb[55].mxu1 }
 0x18c   :  { %v1453_v36 = vmul.f32 0.2, %v1243_v18  ;;  %v1247_v40 = vadd.f32 %v1246_v48, %v4370_v33  ;;  %2394 = vmatprep.mubr.bf16.mxu0 %v1621_v20  ;;  %v1455_v43 = vmul.f32 0.2, %v1346_v9  ;;  %v1350_v22 = vadd.f32 %v1349_v37, %v4375_v39  ;;  %2483 = vmatprep.mubr.bf16.mxu1 %v1623_v51 }
 0x18d   :  { %v1460_v21 = vmul.f32 0.2, %v1245_v13  ;;  %2395 = vmatmul.mubr.bf16.gmra.mrb[104].mxu0 %v1620_v38  ;;  %v1462_v58 = vmul.f32 0.2, %v1348_v62  ;;  %2484 = vmatmul.mubr.bf16.gmra.mrb[104].mxu1 %v1622_v8  ;;  %v1564_v55 = vmax.f32 %v1241_v1, %v1452_v7  ;;  %v1566_v3 = vmax.f32 %v1344_v35, %v1454_v14 }
 0x18e   :  { %v1461_v54 = vmul.f32 0.2, %v1247_v40  ;;  %v1463_v47 = vmul.f32 0.2, %v1350_v22  ;;  %v1565_v4 = vmax.f32 %v1243_v18, %v1453_v36  ;;  %v1567_v31 = vmax.f32 %v1346_v9, %v1455_v43 }
 0x18f   :  { %v1572_v23 = vmax.f32 %v1245_v13, %v1460_v21  ;;  %v1574_v30 = vmax.f32 %v1348_v62, %v1462_v58 }
 0x190   :  { %v1573_v29 = vmax.f32 %v1247_v40, %v1461_v54  ;;  %v1575_v33 = vmax.f32 %v1350_v22, %v1463_v47 }
 0x191   :  { %v1628_v10 = vpack.c.bf16 %v1572_v23, %v1564_v55  ;;  %v1630_v12 = vpack.c.bf16 %v1574_v30, %v1566_v3 }
 0x192   :  { %v1629_v26 = vpack.c.bf16 %v1573_v29, %v1565_v4  ;;  %v1631_v56 = vpack.c.bf16 %v1575_v33, %v1567_v31 }
 0x194   :  { %2402 = vmatprep.mubr.bf16.mxu0 %v1629_v26  ;;  %2491 = vmatprep.mubr.bf16.mxu1 %v1631_v56 }
 0x195   :  { %2403 = vmatmul.mubr.bf16.gmra.mrb[108].mxu0 %v1628_v10  ;;  %2492 = vmatmul.mubr.bf16.gmra.mrb[108].mxu1 %v1630_v12 }
 0x1f8   :  { %v2931_v39 = vpop.f32.mrb[56].mxu0  ;;  %v2989_v34 = vpop.f32.mrb[56].mxu1 }
 0x1f9   :  { %v2932_v45 = vpop.f32.mrb[57].mxu0  ;;  %v2990_v42 = vpop.f32.mrb[57].mxu1 }
 0x1fa   :  { %v2933_v25 = vadd.f32 %v2932_v45, %v2931_v39  ;;  %v2934_v44 = vpop.f32.mrb[58].mxu0  ;;  %v2991_v41 = vadd.f32 %v2990_v42, %v2989_v34  ;;  %v2992_v49 = vpop.f32.mrb[58].mxu1 }
 0x1fb   :  { %v2935_v63 = vpop.f32.mrb[59].mxu0  ;;  %v2993_v28 = vpop.f32.mrb[59].mxu1 }
 0x1fc   :  { %v2936_v52 = vadd.f32 %v2935_v63, %v2934_v44  ;;  %v4409_v32 = vadd.f32 %v2991_v41, %v2933_v25  ;;  %v2994_v53 = vadd.f32 %v2993_v28, %v2992_v49 }
 0x1fe   :  { %v4411_v46 = vadd.f32 %v2994_v53, %v2936_v52 }
 0x200   :  { %v2937_v57 = vpop.f32.mrb[60].mxu0 }
 0x201   :  { %v2995_v24 = vpop.f32.mrb[60].mxu1  ;;  %v2938_v61 = vpop.f32.mrb[61].mxu0 }
 0x202   :  { %v2939_v50 = vadd.f32 %v2938_v61, %v2937_v57  ;;  %v2996_v5 = vpop.f32.mrb[61].mxu1  ;;  %v2940_v59 = vpop.f32.mrb[62].mxu0 }
 0x203   :  { %v2997_v19 = vadd.f32 %v2996_v5, %v2995_v24  ;;  %v2998_v27 = vpop.f32.mrb[62].mxu1  ;;  %v2941_v0 = vpop.f32.mrb[63].mxu0 }
 0x204   :  { %v2942_v11 = vadd.f32 %v2941_v0, %v2940_v59  ;;  %v2999_v15 = vpop.f32.mrb[63].mxu1 }
 0x205   :  { %v4413_v1 = vadd.f32 %v2997_v19, %v2939_v50  ;;  %v3000_v60 = vadd.f32 %v2999_v15, %v2998_v27 }
 0x207   :  { %v4415_v17 = vadd.f32 %v3000_v60, %v2942_v11 }
 0x208   :  { %v2943_v38 = vpop.f32.mrb[64].mxu0 }
 0x209   :  { %v3001_v35 = vpop.f32.mrb[64].mxu1  ;;  %v2944_v18 = vpop.f32.mrb[65].mxu0 }
 0x20a   :  { %v2945_v2 = vadd.f32 %v2944_v18, %v2943_v38  ;;  %v3002_v6 = vpop.f32.mrb[65].mxu1  ;;  %v2946_v20 = vpop.f32.mrb[66].mxu0 }
 0x20b   :  { %v3003_v8 = vadd.f32 %v3002_v6, %v3001_v35  ;;  %v3004_v7 = vpop.f32.mrb[66].mxu1  ;;  %v2947_v9 = vpop.f32.mrb[67].mxu0 }
 0x20c   :  { %v2948_v13 = vadd.f32 %v2947_v9, %v2946_v20  ;;  %v3005_v16 = vpop.f32.mrb[67].mxu1 }
 0x20d   :  { %v4417_v48 = vadd.f32 %v3003_v8, %v2945_v2  ;;  %v3006_v51 = vadd.f32 %v3005_v16, %v3004_v7 }
 0x20f   :  { %v4419_v14 = vadd.f32 %v3006_v51, %v2948_v13 }
 0x210   :  { %v2949_v36 = vpop.f32.mrb[68].mxu0 }
 0x211   :  { %v3007_v62 = vpop.f32.mrb[68].mxu1  ;;  %v2950_v40 = vpop.f32.mrb[69].mxu0 }
 0x212   :  { %v2951_v37 = vadd.f32 %v2950_v40, %v2949_v36  ;;  %v3008_v43 = vpop.f32.mrb[69].mxu1  ;;  %v2952_v21 = vpop.f32.mrb[70].mxu0 }
 0x213   :  { %v3009_v22 = vadd.f32 %v3008_v43, %v3007_v62  ;;  %v3010_v58 = vpop.f32.mrb[70].mxu1  ;;  %v2953_v54 = vpop.f32.mrb[71].mxu0 }
 0x214   :  { %v2954_v55 = vadd.f32 %v2953_v54, %v2952_v21  ;;  %v3011_v23 = vpop.f32.mrb[71].mxu1 }
 0x215   :  { %v4421_v47 = vadd.f32 %v3009_v22, %v2951_v37  ;;  %v3012_v3 = vadd.f32 %v3011_v23, %v3010_v58 }
 0x217   :  { %v4423_v4 = vadd.f32 %v3012_v3, %v2954_v55 }
 0x218   :  { %v2955_v30 = vpop.f32.mrb[72].mxu0 }
 0x219   :  { %v3013_v29 = vpop.f32.mrb[72].mxu1  ;;  %v2956_v31 = vpop.f32.mrb[73].mxu0 }
 0x21a   :  { %v2957_v33 = vadd.f32 %v2956_v31, %v2955_v30  ;;  %v3014_v10 = vpop.f32.mrb[73].mxu1  ;;  %v2958_v26 = vpop.f32.mrb[74].mxu0 }
 0x21b   :  { %v3015_v12 = vadd.f32 %v3014_v10, %v3013_v29  ;;  %v3016_v56 = vpop.f32.mrb[74].mxu1  ;;  %v2959_v39 = vpop.f32.mrb[75].mxu0 }
 0x21c   :  { %v2960_v34 = vadd.f32 %v2959_v39, %v2958_v26  ;;  %v3017_v45 = vpop.f32.mrb[75].mxu1 }
 0x21d   :  { %v4425_v25 = vadd.f32 %v3015_v12, %v2957_v33  ;;  %v3018_v42 = vadd.f32 %v3017_v45, %v3016_v56 }
 0x21f   :  { %v4427_v44 = vadd.f32 %v3018_v42, %v2960_v34 }
 0x220   :  { %v2961_v41 = vpop.f32.mrb[76].mxu0 }
 0x221   :  { %v3019_v49 = vpop.f32.mrb[76].mxu1  ;;  %v2962_v63 = vpop.f32.mrb[77].mxu0 }
 0x222   :  { %v2963_v52 = vadd.f32 %v2962_v63, %v2961_v41  ;;  %v3020_v28 = vpop.f32.mrb[77].mxu1  ;;  %v2964_v53 = vpop.f32.mrb[78].mxu0 }
 0x223   :  { %v3021_v57 = vadd.f32 %v3020_v28, %v3019_v49  ;;  %v3022_v24 = vpop.f32.mrb[78].mxu1  ;;  %v2965_v61 = vpop.f32.mrb[79].mxu0 }
 0x224   :  { %v2966_v50 = vadd.f32 %v2965_v61, %v2964_v53  ;;  %v3023_v5 = vpop.f32.mrb[79].mxu1 }
 0x225   :  { %v4429_v59 = vadd.f32 %v3021_v57, %v2963_v52  ;;  %v3024_v19 = vadd.f32 %v3023_v5, %v3022_v24 }
 0x227   :  { %v4431_v27 = vadd.f32 %v3024_v19, %v2966_v50 }
 0x228   :  { %v2967_v0 = vpop.f32.mrb[80].mxu0 }
 0x229   :  { %v3025_v11 = vpop.f32.mrb[80].mxu1  ;;  %v2968_v15 = vpop.f32.mrb[81].mxu0 }
 0x22a   :  { %v2969_v60 = vadd.f32 %v2968_v15, %v2967_v0  ;;  %v3026_v38 = vpop.f32.mrb[81].mxu1  ;;  %v2970_v35 = vpop.f32.mrb[82].mxu0 }
 0x22b   :  { %v3027_v18 = vadd.f32 %v3026_v38, %v3025_v11  ;;  %v3028_v2 = vpop.f32.mrb[82].mxu1  ;;  %v2971_v6 = vpop.f32.mrb[83].mxu0 }
 0x22c   :  { %v2972_v20 = vadd.f32 %v2971_v6, %v2970_v35  ;;  %v3029_v8 = vpop.f32.mrb[83].mxu1 }
 0x22d   :  { %v4433_v7 = vadd.f32 %v3027_v18, %v2969_v60  ;;  %v3030_v9 = vadd.f32 %v3029_v8, %v3028_v2 }
 0x22f   :  { %v4435_v13 = vadd.f32 %v3030_v9, %v2972_v20 }
 0x238   :  { %v3047_v16 = vpop.f32.mrb[84].mxu0  ;;  %v3105_v51 = vpop.f32.mrb[84].mxu1 }
 0x239   :  { %v3048_v36 = vpop.f32.mrb[85].mxu0  ;;  %v3106_v40 = vpop.f32.mrb[85].mxu1 }
 0x23a   :  { %v3049_v62 = vadd.f32 %v3048_v36, %v3047_v16  ;;  %v3050_v37 = vpop.f32.mrb[86].mxu0  ;;  %v3107_v43 = vadd.f32 %v3106_v40, %v3105_v51  ;;  %v3108_v21 = vpop.f32.mrb[86].mxu1 }
 0x23b   :  { %v3051_v22 = vpop.f32.mrb[87].mxu0  ;;  %v3109_v55 = vpop.f32.mrb[87].mxu1 }
 0x23c   :  { %v2357_v58 = vadd.f32 %v3049_v62, %v4409_v32  ;;  %v3052_v54 = vadd.f32 %v3051_v22, %v3050_v37  ;;  %v3110_v23 = vadd.f32 %v3109_v55, %v3108_v21 }
 0x23e   :  { %v4438_v3 = vadd.f32 %v3107_v43, %v2357_v58  ;;  %v2360_v30 = vadd.f32 %v3052_v54, %v4411_v46  ;;  %v13_v46 = vstv %s4570_s7 }
 0x23f   :  { %14 = vst [vmem:[#allocation2] sm:$0x1] %v13_v46 }
 0x240   :  { %v4441_v29 = vadd.f32 %v3110_v23, %v2360_v30  ;;  %v3053_v31 = vpop.f32.mrb[88].mxu0  ;;  %v3111_v33 = vpop.f32.mrb[88].mxu1  ;;  %v2519_v19 = vmul.f32 %v4438_v3, %v4438_v3 }
 0x241   :  { %v3054_v10 = vpop.f32.mrb[89].mxu0  ;;  %v3112_v12 = vpop.f32.mrb[89].mxu1 }
 0x242   :  { %v3055_v26 = vadd.f32 %v3054_v10, %v3053_v31  ;;  %v3056_v56 = vpop.f32.mrb[90].mxu0  ;;  %v3113_v39 = vadd.f32 %v3112_v12, %v3111_v33  ;;  %v3114_v34 = vpop.f32.mrb[90].mxu1 }
 0x243   :  { %v3057_v45 = vpop.f32.mrb[91].mxu0  ;;  %v3115_v41 = vpop.f32.mrb[91].mxu1 }
 0x244   :  { %v2365_v32 = vadd.f32 %v3055_v26, %v4413_v1  ;;  %v3058_v42 = vadd.f32 %v3057_v45, %v3056_v56  ;;  %v3116_v49 = vadd.f32 %v3115_v41, %v3114_v34  ;;  %v2520_v1 = vmul.f32 %v4441_v29, %v4441_v29 }
 0x246   :  { %v4447_v63 = vadd.f32 %v3113_v39, %v2365_v32  ;;  %v2368_v52 = vadd.f32 %v3058_v42, %v4415_v17  ;;  %v2500_v17 = vadd.f32 %v4441_v29, %v4438_v3  ;;  %v2533_v6 = vadd.f32 %v2520_v1, %v2519_v19 }
 0x248   :  { %v4450_v28 = vadd.f32 %v3116_v49, %v2368_v52  ;;  %v3059_v53 = vpop.f32.mrb[92].mxu0  ;;  %v3117_v57 = vpop.f32.mrb[92].mxu1  ;;  %v2521_v60 = vmul.f32 %v4447_v63, %v4447_v63  ;;  %v2501_v20 = vadd.f32 %v2500_v17, %v4447_v63 }
 0x249   :  { %v3060_v24 = vpop.f32.mrb[93].mxu0  ;;  %v3118_v50 = vpop.f32.mrb[93].mxu1 }
 0x24a   :  { %v3061_v61 = vadd.f32 %v3060_v24, %v3059_v53  ;;  %v3062_v5 = vpop.f32.mrb[94].mxu0  ;;  %v3119_v0 = vadd.f32 %v3118_v50, %v3117_v57  ;;  %v3120_v11 = vpop.f32.mrb[94].mxu1  ;;  %v2534_v16 = vadd.f32 %v2533_v6, %v2521_v60  ;;  %v2522_v51 = vmul.f32 %v4450_v28, %v4450_v28 }
 0x24b   :  { %v3063_v15 = vpop.f32.mrb[95].mxu0  ;;  %v3121_v18 = vpop.f32.mrb[95].mxu1 }
 0x24c   :  { %v2373_v38 = vadd.f32 %v3061_v61, %v4417_v48  ;;  %v3064_v35 = vadd.f32 %v3063_v15, %v3062_v5  ;;  %v3122_v2 = vadd.f32 %v3121_v18, %v3120_v11  ;;  %v2502_v48 = vadd.f32 %v2501_v20, %v4450_v28 }
 0x24d   :  { %v2535_v23 = vadd.f32 %v2534_v16, %v2522_v51 }
 0x24e   :  { %v4462_v8 = vadd.f32 %v3119_v0, %v2373_v38  ;;  %v2376_v9 = vadd.f32 %v3064_v35, %v4419_v14 }
 0x250   :  { %v4467_v36 = vadd.f32 %v3122_v2, %v2376_v9  ;;  %v3065_v62 = vpop.f32.mrb[96].mxu0  ;;  %v3123_v40 = vpop.f32.mrb[96].mxu1  ;;  %v2523_v43 = vmul.f32 %v4462_v8, %v4462_v8  ;;  %v2503_v30 = vadd.f32 %v2502_v48, %v4462_v8 }
 0x251   :  { %v3066_v37 = vpop.f32.mrb[97].mxu0  ;;  %v3124_v22 = vpop.f32.mrb[97].mxu1 }
 0x252   :  { %v3067_v21 = vadd.f32 %v3066_v37, %v3065_v62  ;;  %v3068_v58 = vpop.f32.mrb[98].mxu0  ;;  %v3125_v54 = vadd.f32 %v3124_v22, %v3123_v40  ;;  %v3126_v55 = vpop.f32.mrb[98].mxu1  ;;  %v2536_v12 = vadd.f32 %v2535_v23, %v2523_v43  ;;  %v2524_v56 = vmul.f32 %v4467_v36, %v4467_v36 }
 0x253   :  { %v3069_v14 = vpop.f32.mrb[99].mxu0  ;;  %v3127_v10 = vpop.f32.mrb[99].mxu1  ;;  %v2504_v45 = vadd.f32 %v2503_v30, %v4467_v36 }
 0x254   :  { %v2381_v31 = vadd.f32 %v3067_v21, %v4421_v47  ;;  %v3070_v33 = vadd.f32 %v3069_v14, %v3068_v58  ;;  %v3128_v26 = vadd.f32 %v3127_v10, %v3126_v55  ;;  %v2537_v46 = vadd.f32 %v2536_v12, %v2524_v56 }
 0x256   :  { %v4476_v39 = vadd.f32 %v3125_v54, %v2381_v31  ;;  %v2384_v34 = vadd.f32 %v3070_v33, %v4423_v4 }
 0x258   :  { %v2525_v32 = vmul.f32 %v4476_v39, %v4476_v39  ;;  %v4482_v42 = vadd.f32 %v3128_v26, %v2384_v34  ;;  %v3071_v41 = vpop.f32.mrb[100].mxu0  ;;  %v3129_v47 = vpop.f32.mrb[100].mxu1  ;;  %v2505_v52 = vadd.f32 %v2504_v45, %v4476_v39 }
 0x259   :  { %v3072_v49 = vpop.f32.mrb[101].mxu0  ;;  %v3130_v57 = vpop.f32.mrb[101].mxu1 }
 0x25a   :  { %v3073_v53 = vadd.f32 %v3072_v49, %v3071_v41  ;;  %v3074_v24 = vpop.f32.mrb[102].mxu0  ;;  %v3131_v1 = vadd.f32 %v3130_v57, %v3129_v47  ;;  %v3132_v61 = vpop.f32.mrb[102].mxu1  ;;  %v2538_v4 = vadd.f32 %v2537_v46, %v2525_v32  ;;  %v2526_v5 = vmul.f32 %v4482_v42, %v4482_v42 }
 0x25b   :  { %v3075_v50 = vpop.f32.mrb[103].mxu0  ;;  %v3133_v11 = vpop.f32.mrb[103].mxu1  ;;  %v2506_v17 = vadd.f32 %v2505_v52, %v4482_v42 }
 0x25c   :  { %v2389_v19 = vadd.f32 %v3073_v53, %v4425_v25  ;;  %v3076_v0 = vadd.f32 %v3075_v50, %v3074_v24  ;;  %v3134_v15 = vadd.f32 %v3133_v11, %v3132_v61  ;;  %v2539_v35 = vadd.f32 %v2538_v4, %v2526_v5 }
 0x25e   :  { %v4489_v60 = vadd.f32 %v3131_v1, %v2389_v19  ;;  %v2392_v38 = vadd.f32 %v3076_v0, %v4427_v44 }
 0x260   :  { %v2507_v18 = vadd.f32 %v2506_v17, %v4489_v60  ;;  %v2527_v2 = vmul.f32 %v4489_v60, %v4489_v60  ;;  %v4495_v6 = vadd.f32 %v3134_v15, %v2392_v38  ;;  %v3077_v20 = vpop.f32.mrb[104].mxu0  ;;  %v3135_v9 = vpop.f32.mrb[104].mxu1 }
 0x261   :  { %v3078_v25 = vpop.f32.mrb[105].mxu0  ;;  %v3136_v37 = vpop.f32.mrb[105].mxu1 }
 0x262   :  { %v2540_v16 = vadd.f32 %v2539_v35, %v2527_v2  ;;  %v2508_v51 = vadd.f32 %v2507_v18, %v4495_v6  ;;  %v2528_v62 = vmul.f32 %v4495_v6, %v4495_v6  ;;  %v3079_v40 = vadd.f32 %v3078_v25, %v3077_v20  ;;  %v3080_v44 = vpop.f32.mrb[106].mxu0  ;;  %v3138_v43 = vpop.f32.mrb[106].mxu1 }
 0x263   :  { %v3137_v48 = vadd.f32 %v3136_v37, %v3135_v9  ;;  %v3081_v21 = vpop.f32.mrb[107].mxu0  ;;  %v3139_v55 = vpop.f32.mrb[107].mxu1 }
 0x264   :  { %v2541_v22 = vadd.f32 %v2540_v16, %v2528_v62  ;;  %v2397_v58 = vadd.f32 %v3079_v40, %v4429_v59  ;;  %v3082_v54 = vadd.f32 %v3081_v21, %v3080_v44  ;;  %v3140_v14 = vadd.f32 %v3139_v55, %v3138_v43 }
 0x266   :  { %v4501_v23 = vadd.f32 %v3137_v48, %v2397_v58  ;;  %v2400_v30 = vadd.f32 %v3082_v54, %v4431_v27  ;;  %v2557_v54 = vld [vmem:[%s4571_s4] sm:$0x1] }
 0x268   :  { %v2509_v31 = vadd.f32 %v2508_v51, %v4501_v23  ;;  %v2529_v33 = vmul.f32 %v4501_v23, %v4501_v23  ;;  %v4507_v10 = vadd.f32 %v3140_v14, %v2400_v30  ;;  %v3083_v26 = vpop.f32.mrb[108].mxu0  ;;  %v3141_v12 = vpop.f32.mrb[108].mxu1 }
 0x269   :  { %v3084_v56 = vpop.f32.mrb[109].mxu0  ;;  %v3142_v41 = vpop.f32.mrb[109].mxu1 }
 0x26a   :  { %v2542_v34 = vadd.f32 %v2541_v22, %v2529_v33  ;;  %v2510_v59 = vadd.f32 %v2509_v31, %v4507_v10  ;;  %v2530_v45 = vmul.f32 %v4507_v10, %v4507_v10  ;;  %v3085_v32 = vadd.f32 %v3084_v56, %v3083_v26  ;;  %v3086_v47 = vpop.f32.mrb[110].mxu0  ;;  %v3144_v49 = vpop.f32.mrb[110].mxu1  ;;  %v2561_v31 = vld [vmem:[%s4572_s5] sm:$0x1] }
 0x26b   :  { %v3143_v27 = vadd.f32 %v3142_v41, %v3141_v12  ;;  %v3087_v46 = vpop.f32.mrb[111].mxu0  ;;  %v3145_v24 = vpop.f32.mrb[111].mxu1  ;;  %v2565_v22 = vlaneseq }
 0x26c   :  { %v2543_v52 = vadd.f32 %v2542_v34, %v2530_v45  ;;  %v2405_v53 = vadd.f32 %v3085_v32, %v4433_v7  ;;  %v3088_v57 = vadd.f32 %v3087_v46, %v3086_v47  ;;  %v3146_v1 = vadd.f32 %v3145_v24, %v3144_v49 }
 0x26d   :  { %v2566_v58 = vshrl.u32 %v2565_v22, 7 }
 0x26e   :  { %v2494_v61 = vadd.f32 %v3143_v27, %v2405_v53  ;;  %v2408_v50 = vadd.f32 %v3088_v57, %v4435_v13 }
 0x26f   :  { %v4517_v55 = vsub.s32 0, %v2566_v58 }
 0x270   :  { %v2511_v4 = vadd.f32 %v2510_v59, %v2494_v61  ;;  %v2531_v5 = vmul.f32 %v2494_v61, %v2494_v61  ;;  %v2497_v19 = vadd.f32 %v3146_v1, %v2408_v50 }
 0x272   :  { %v2544_v0 = vadd.f32 %v2543_v52, %v2531_v5  ;;  %v2512_v11 = vadd.f32 %v2511_v4, %v2497_v19  ;;  %v2532_v15 = vmul.f32 %v2497_v19, %v2497_v19 }
 0x274   :  { %v2513_v17 = vrot.slane %v2512_v11, 4  ;;  %v2545_v38 = vadd.f32 %v2544_v0, %v2532_v15  ;;  %v2633_v0 = vld [vmem:[%s4573_s6 + $0x8] sm:$0xff] }
 0x276   :  { %v2514_v35 = vadd.f32 %v2513_v17, %v2512_v11  ;;  %v2546_v18 = vrot.slane %v2545_v38, 4  ;;  %v2634_v17 = vld [vmem:[%s4573_s6 + $0x10] sm:$0xff] }
 0x278   :  { %v2515_v2 = vrot.slane %v2514_v35, 2  ;;  %v2547_v20 = vadd.f32 %v2546_v18, %v2545_v38 }
 0x27a   :  { %v2516_v9 = vadd.f32 %v2515_v2, %v2514_v35  ;;  %v2548_v7 = vrot.slane %v2547_v20, 2 }
 0x27c   :  { %v2517_v25 = vrot.slane %v2516_v9, 1  ;;  %v2549_v16 = vadd.f32 %v2548_v7, %v2547_v20 }
 0x27e   :  { %v2518_v51 = vadd.f32 %v2517_v25, %v2516_v9  ;;  %v2550_v62 = vrot.slane %v2549_v16, 1  ;;  %v2635_v9 = vld [vmem:[%s4573_s6 + $0x18] sm:$0xff] }
 0x280   :  { %v2551_v40 = vadd.f32 %v2550_v62, %v2549_v16  ;;  %v2552_v13 = vmul.f32 0.010204081, %v2518_v51 }
 0x282   :  { %v2553_v37 = vmul.f32 0.010204081, %v2551_v40  ;;  %v2554_v44 = vmul.f32 %v2552_v13, %v2552_v13  ;;  %v2636_v40 = vld [vmem:[%s4573_s6 + $0x20] sm:$0xff] }
 0x284   :  { %v2555_v48 = vsub.f32 %v2553_v37, %v2554_v44 }
 0x286   :  { %v2556_v43 = vmax.f32 %v2555_v48, 0.0 }
 0x288   :  { %v2558_v21 = vadd.f32 1e-05, %v2556_v43 }
 0x28a   :  { %3235 = vrsqrt.f32 %v2558_v21 }
 0x294   :  { %v3236_v14 = vpop.eup %3235 }
 0x295   :  { %v2560_v30 = vmul.f32 %v3236_v14, %v2557_v54  ;;  %v2637_v54 = vld [vmem:[%s4573_s6 + $0x28] sm:$0xff] }
 0x297   :  { %v2562_v33 = vmul.f32 %v2560_v30, %v2552_v13  ;;  %v2568_v26 = vrot.slane %v2560_v30, %v4517_v55 }
 0x299   :  { %v2563_v12 = vsub.f32 %v2561_v31, %v2562_v33  ;;  %v2583_v56 = vmul.f32 %v2568_v26, %v2497_v19  ;;  %v2570_v34 = vmul.f32 %v2568_v26, %v4438_v3  ;;  %v2571_v59 = vmul.f32 %v2568_v26, %v4441_v29 }
 0x29a   :  { %v2572_v45 = vmul.f32 %v2568_v26, %v4447_v63  ;;  %v2573_v32 = vmul.f32 %v2568_v26, %v4450_v28  ;;  %v2574_v41 = vmul.f32 %v2568_v26, %v4462_v8  ;;  %v2575_v47 = vmul.f32 %v2568_v26, %v4467_v36 }
 0x29b   :  { %v2588_v27 = vrot.slane %v2563_v12, %v4517_v55  ;;  %v2576_v49 = vmul.f32 %v2568_v26, %v4476_v39  ;;  %v2577_v46 = vmul.f32 %v2568_v26, %v4482_v42  ;;  %v2578_v52 = vmul.f32 %v2568_v26, %v4489_v60 }
 0x29c   :  { %v2579_v3 = vmul.f32 %v2568_v26, %v4495_v6  ;;  %v2580_v29 = vmul.f32 %v2568_v26, %v4501_v23  ;;  %v2581_v63 = vmul.f32 %v2568_v26, %v4507_v10  ;;  %v2582_v53 = vmul.f32 %v2568_v26, %v2494_v61  ;;  %v2632_v6 = vld [vmem:[%s4573_s6] sm:$0xff] }
 0x29d   :  { %v4536_v28 = vadd.f32 %v2588_v27, %v2583_v56  ;;  %v2590_v8 = vadd.f32 %v2588_v27, %v2570_v34  ;;  %v2591_v57 = vadd.f32 %v2588_v27, %v2571_v59  ;;  %v2592_v36 = vadd.f32 %v2588_v27, %v2572_v45  ;;  %v2638_v59 = vld [vmem:[%s4573_s6 + $0x30] sm:$0xff] }
 0x29e   :  { %v2593_v24 = vadd.f32 %v2588_v27, %v2573_v32  ;;  %v2594_v1 = vadd.f32 %v2588_v27, %v2574_v41  ;;  %v2595_v50 = vadd.f32 %v2588_v27, %v2575_v47  ;;  %v2596_v39 = vadd.f32 %v2588_v27, %v2576_v49 }
 0x29f   :  { %v2604_v4 = vmul.f32 0.2, %v2590_v8  ;;  %v2605_v42 = vmul.f32 0.2, %v2591_v57  ;;  %v2597_v5 = vadd.f32 %v2588_v27, %v2577_v46  ;;  %v2606_v60 = vmul.f32 0.2, %v2592_v36 }
 0x2a0   :  { %v2607_v19 = vmul.f32 0.2, %v2593_v24  ;;  %v2598_v23 = vadd.f32 %v2588_v27, %v2578_v52  ;;  %v2608_v10 = vmul.f32 0.2, %v2594_v1  ;;  %v2609_v38 = vmul.f32 0.2, %v2595_v50 }
 0x2a1   :  { %v2618_v61 = vmax.f32 %v2590_v8, %v2604_v4  ;;  %v2619_v11 = vmax.f32 %v2591_v57, %v2605_v42  ;;  %v2620_v15 = vmax.f32 %v2592_v36, %v2606_v60  ;;  %v2599_v2 = vadd.f32 %v2588_v27, %v2579_v3 }
 0x2a2   :  { %v2621_v35 = vmax.f32 %v2593_v24, %v2607_v19  ;;  %v2610_v20 = vmul.f32 0.2, %v2596_v39  ;;  %v2622_v25 = vmax.f32 %v2594_v1, %v2608_v10  ;;  %v2600_v51 = vadd.f32 %v2588_v27, %v2580_v29 }
 0x2a3   :  { %v2639_v18 = vmul.f32 %v2632_v6, %v2618_v61  ;;  %v2640_v7 = vmul.f32 %v2633_v0, %v2619_v11  ;;  %v2641_v16 = vmul.f32 %v2634_v17, %v2620_v15  ;;  %v2601_v62 = vadd.f32 %v2588_v27, %v2581_v63 }
 0x2a4   :  { %v2602_v37 = vadd.f32 %v2588_v27, %v2582_v53  ;;  %v2611_v44 = vmul.f32 0.2, %v2597_v5  ;;  %v2612_v48 = vmul.f32 0.2, %v2598_v23  ;;  %v2623_v43 = vmax.f32 %v2595_v50, %v2609_v38 }
 0x2a5   :  { %v2646_v13 = vadd.f32 %v2640_v7, %v2639_v18  ;;  %v2642_v21 = vmul.f32 %v2635_v9, %v2621_v35  ;;  %v2613_v22 = vmul.f32 0.2, %v2599_v2  ;;  %v2614_v58 = vmul.f32 0.2, %v2600_v51 }
 0x2a6   :  { %v2615_v30 = vmul.f32 0.2, %v2601_v62  ;;  %v2625_v31 = vmax.f32 %v2597_v5, %v2611_v44  ;;  %v2626_v33 = vmax.f32 %v2598_v23, %v2612_v48  ;;  %v2624_v26 = vmax.f32 %v2596_v39, %v2610_v20  ;;  %v2660_v20 = vld [vmem:[#allocation2] sm:$0x1] }
 0x2a7   :  { %v2647_v14 = vadd.f32 %v2646_v13, %v2641_v16  ;;  %v2643_v12 = vmul.f32 %v2636_v40, %v2622_v25  ;;  %v2616_v56 = vmul.f32 0.2, %v2602_v37  ;;  %v2627_v34 = vmax.f32 %v2599_v2, %v2613_v22 }
 0x2a8   :  { %v2628_v32 = vmax.f32 %v2600_v51, %v2614_v58  ;;  %v2671_v41 = vmul.f32 %v2632_v6, %v2625_v31  ;;  %v2672_v47 = vmul.f32 %v2633_v0, %v2626_v33  ;;  %v2617_v27 = vmul.f32 0.2, %v4536_v28 }
 0x2a9   :  { %v2648_v45 = vadd.f32 %v2647_v14, %v2642_v21  ;;  %v2644_v49 = vmul.f32 %v2637_v54, %v2623_v43  ;;  %v2629_v52 = vmax.f32 %v2601_v62, %v2615_v30  ;;  %v2673_v3 = vmul.f32 %v2634_v17, %v2627_v34 }
 0x2aa   :  { %v2678_v29 = vadd.f32 %v2672_v47, %v2671_v41  ;;  %v2645_v63 = vmul.f32 %v2638_v59, %v2624_v26  ;;  %v2630_v8 = vmax.f32 %v2602_v37, %v2616_v56  ;;  %v2674_v57 = vmul.f32 %v2635_v9, %v2628_v32 }
 0x2ab   :  { %v2649_v46 = vadd.f32 %v2648_v45, %v2643_v12  ;;  %v2631_v24 = vmax.f32 %v4536_v28, %v2617_v27  ;;  %v2675_v50 = vmul.f32 %v2636_v40, %v2629_v52  ;;  %v3237_v2 = vmov 0  }
 0x2ac   :  { %v2679_v36 = vadd.f32 %v2678_v29, %v2673_v3  ;;  %v2676_v42 = vmul.f32 %v2637_v54, %v2630_v8  ;;  %3148 = vset.pattern.permute.xlu1 %v3237_v2  ;;  %3149 = vset.pattern.permute.xlu0 %v3237_v2 }
 0x2ad   :  { %v2650_v53 = vadd.f32 %v2649_v46, %v2644_v49  ;;  %v2677_v19 = vmul.f32 %v2638_v59, %v2631_v24 }
 0x2ae   :  { %v2680_v39 = vadd.f32 %v2679_v36, %v2674_v57 }
 0x2af   :  { %v2651_v1 = vadd.f32 %v2650_v53, %v2645_v63 }
 0x2b0   :  { %v2681_v5 = vadd.f32 %v2680_v39, %v2675_v50 }
 0x2b1   :  { %v2652_v4 = vrot.slane %v2651_v1, 4 }
 0x2b2   :  { %v2682_v6 = vadd.f32 %v2681_v5, %v2676_v42 }
 0x2b3   :  { %v2653_v60 = vadd.f32 %v2652_v4, %v2651_v1 }
 0x2b4   :  { %v2683_v10 = vadd.f32 %v2682_v6, %v2677_v19 }
 0x2b5   :  { %v2654_v23 = vrot.slane %v2653_v60, 2 }
 0x2b6   :  { %v2684_v0 = vrot.slane %v2683_v10, 4 }
 0x2b7   :  { %v2655_v61 = vadd.f32 %v2654_v23, %v2653_v60 }
 0x2b8   :  { %v2685_v15 = vadd.f32 %v2684_v0, %v2683_v10 }
 0x2b9   :  { %v2656_v11 = vrot.slane %v2655_v61, 1 }
 0x2ba   :  { %v2686_v38 = vrot.slane %v2685_v15, 2 }
 0x2bb   :  { %v2657_v17 = vadd.f32 %v2656_v11, %v2655_v61 }
 0x2bc   :  { %v2687_v35 = vadd.f32 %v2686_v38, %v2685_v15 }
 0x2bd   :  { %2658 = vadd.xlane.f32.xlu0 %v2657_v17 }
 0x2be   :  { %v2688_v28 = vrot.slane %v2687_v35, 1 }
 0x2c0   :  { %v2689_v18 = vadd.f32 %v2688_v28, %v2687_v35 }
 0x2c2   :  { %2690 = vadd.xlane.f32.xlu0 %v2689_v18 }
 0x34a   :  { %v2659_v9 = vpop.xlane.xlu0 %2658 }
 0x34b   :  { %v2661_v7 = vadd.f32 %v2660_v20, %v2659_v9 }
 0x34d   :  { %2664 = vperm.xlu1 %3148, %v2661_v7  }
 0x34f   :  { %v2691_v25 = vpop.xlane.xlu0 %2690 }
 0x350   :  { %v2692_v16 = vadd.f32 %v2691_v25, %v2660_v20 }
 0x352   :  { %2695 = vperm.xlu1 %3148, %v2692_v16  }
 0x3cc   :  { %v2665_v51 = vpop.permute.xlu1 %2664 }
 0x3cd   :  { %v2670_v40 = vrot.slane %v2665_v51, %v4517_v55 }
 0x3d1   :  { %v2696_v62 = vpop.permute.xlu1 %2695 }
 0x3d2   :  { %v2701_v13 = vrot.slane %v2696_v62, %v4517_v55 }
 0x3d4   :  { %v2703_v37 = vsel %vm2702_vm0, %v2670_v40, %v2701_v13 }
 0x3d5   :  { %2704 = vst [vmem:[%s4574_s8] sm:$0x3] %v2703_v37 }

</bundles_post_ra>
